<compile_context>
chip_gen: v7x
topology: tpu7x:2x2x1
jax: 0.10.0
libtpu: 0.0.40
codegen_flags: <defaults>
</compile_context>

<pallas_src>
import functools

import numpy as np

import jax
import jax.numpy as jnp
from jax import lax
from jax.experimental import pallas as pl
from jax.experimental.pallas import tpu as pltpu

LANE = 128   # conv outputs are computed into 128-lane column groups


def _round_up(x, m):
    return (x + m - 1) // m * m


def _pick_tile_m(m, cap):
    """Row tile: multiple of 8 (or the full dim), <= cap, >=2 blocks when
    worthwhile so both v7x TensorCores are used."""
    if m > cap:
        return cap                                   # cap is a multiple of 8
    if m >= 64 and m % 8 == 0:
        return _round_up(pl.cdiv(m, 2), 8)           # ~2 "parallel" blocks
    return m                                         # single full block


# ----------------------------------------------------------------------------
# Pallas kernels
# ----------------------------------------------------------------------------
def _conv_pool_kernel(x_ref, w_ref, b_ref, o_ref, *, c_out):
    """Fused conv (as matmul) + 2x2 max-pool + bias + ReLU.

    x: (tile_m, K)   bf16  one row per *pooled* output pixel (6x6/stride-2 patch)
    w: (K, 4*LANE)   bf16  column group j = conv weights at pool sub-position j
    b: (1, LANE)     f32   conv bias (zero padded)
    o: (tile_m, c_out)     pooled activations, only the real channels
    """
    acc = jnp.dot(x_ref[...], w_ref[...], preferred_element_type=jnp.float32)
    m = jnp.maximum(
        jnp.maximum(acc[:, 0 * LANE:1 * LANE], acc[:, 1 * LANE:2 * LANE]),
        jnp.maximum(acc[:, 2 * LANE:3 * LANE], acc[:, 3 * LANE:4 * LANE]))
    m = jnp.maximum(m + b_ref[...], 0.0)          # max / +bias / ReLU commute
    o_ref[...] = m[:, :c_out].astype(o_ref.dtype)


def _fc_fused_kernel(x_ref, w1_ref, b1_ref, w2_ref, b2_ref, w3_ref, b3_ref,
                     o_ref):
    # fc1 -> ReLU -> fc2 -> ReLU -> fc3, all resident in VMEM, f32 accumulate.
    h = jnp.dot(x_ref[...], w1_ref[...], preferred_element_type=jnp.float32)
    h = jnp.maximum(h + b1_ref[...], 0.0).astype(w2_ref.dtype)
    h = jnp.dot(h, w2_ref[...], preferred_element_type=jnp.float32)
    h = jnp.maximum(h + b2_ref[...], 0.0).astype(w3_ref.dtype)
    h = jnp.dot(h, w3_ref[...], preferred_element_type=jnp.float32)
    o_ref[...] = (h + b3_ref[...]).astype(o_ref.dtype)


# ----------------------------------------------------------------------------
# Pallas wrappers
# ----------------------------------------------------------------------------
def conv_pool(x2d, w, b, *, c_out, out_dtype=jnp.bfloat16, tile_m_cap=1024):
    """Rows = pooled output pixels; one fused matmul+pool+bias+ReLU kernel."""
    M, K = x2d.shape
    N = w.shape[1]
    tile_m = _pick_tile_m(M, tile_m_cap)
    grid = (pl.cdiv(M, tile_m),)
    bytes_acc = (M * K * x2d.dtype.itemsize + K * N * w.dtype.itemsize
                 + b.size * 4 + M * c_out * jnp.dtype(out_dtype).itemsize)
    return pl.pallas_call(
        functools.partial(_conv_pool_kernel, c_out=c_out),
        out_shape=jax.ShapeDtypeStruct((M, c_out), out_dtype),
        grid=grid,
        in_specs=[
            pl.BlockSpec((tile_m, K), lambda i: (i, 0)),
            pl.BlockSpec((K, N), lambda i: (0, 0)),        # resident weight
            pl.BlockSpec((1, LANE), lambda i: (0, 0)),     # resident bias
        ],
        out_specs=pl.BlockSpec((tile_m, c_out), lambda i: (i, 0)),
        compiler_params=pltpu.CompilerParams(
            dimension_semantics=("parallel",)),
        cost_estimate=pl.CostEstimate(flops=2 * M * K * N, transcendentals=0,
                                      bytes_accessed=bytes_acc),
    )(x2d, w, b)


def fc_fused(x, p, *, out_dtype=jnp.float32, tile_m_cap=1024):
    """relu(relu(x@W1+b1)@W2+b2)@W3+b3 in ONE pallas_call."""
    M, K = x.shape
    N3 = p["fc3_w"].shape[1]
    tile_m = _pick_tile_m(M, tile_m_cap)
    grid = (pl.cdiv(M, tile_m),)

    def resident(arr):
        shape = arr.shape
        return pl.BlockSpec(shape, lambda i: (0,) * len(shape))

    flops = 2 * M * (p["fc1_w"].shape[0] * p["fc1_w"].shape[1]
                     + p["fc2_w"].shape[0] * p["fc2_w"].shape[1]
                     + p["fc3_w"].shape[0] * N3)
    w_bytes = sum(int(p[k].size) * p[k].dtype.itemsize
                  for k in ("fc1_w", "fc1_b", "fc2_w", "fc2_b",
                            "fc3_w", "fc3_b"))
    bytes_acc = M * K * x.dtype.itemsize + w_bytes + M * N3 * 4
    return pl.pallas_call(
        _fc_fused_kernel,
        out_shape=jax.ShapeDtypeStruct((M, N3), out_dtype),
        grid=grid,
        in_specs=[
            pl.BlockSpec((tile_m, K), lambda i: (i, 0)),
            resident(p["fc1_w"]), resident(p["fc1_b"]),
            resident(p["fc2_w"]), resident(p["fc2_b"]),
            resident(p["fc3_w"]), resident(p["fc3_b"]),
        ],
        out_specs=pl.BlockSpec((tile_m, N3), lambda i: (i, 0)),
        compiler_params=pltpu.CompilerParams(
            dimension_semantics=("parallel",)),
        cost_estimate=pl.CostEstimate(flops=flops, transcendentals=0,
                                      bytes_accessed=bytes_acc),
    )(x, p["fc1_w"], p["fc1_b"], p["fc2_w"], p["fc2_b"],
      p["fc3_w"], p["fc3_b"])


# ----------------------------------------------------------------------------
# Parameter preparation (once, outside jit)
# ----------------------------------------------------------------------------
def _patch_feature_map(cin, layout):
    """Measure lax.conv_general_dilated_patches' feature ordering for a
    6x6/stride-2 window: feature f -> (channel, dy, dx) inside the window."""
    S = 8
    if layout == "NCHW":
        v = np.arange(cin * S * S, dtype=np.float32).reshape(1, cin, S, S)
        dn = ("NCHW", "OIHW", "NHWC")
    else:  # NHWC
        v = np.arange(S * S * cin, dtype=np.float32).reshape(1, S, S, cin)
        dn = ("NHWC", "HWIO", "NHWC")
    patches = lax.conv_general_dilated_patches(
        jnp.asarray(v), (6, 6), (2, 2), "VALID", dimension_numbers=dn)
    f = np.asarray(patches[0, 0, 0, :]).astype(np.int64)   # source flat index
    if layout == "NCHW":
        c, dy, dx = f // (S * S), (f % (S * S)) // S, f % S
    else:
        dy, dx, c = f // (S * cin), (f % (S * cin)) // cin, f % cin
    return c, dy, dx


def _build_conv_pool_weight(w_oihw, layout):
    """PyTorch (Cout, Cin, 5, 5) conv weight -> (Cin*36, 4*LANE) fused
    conv + 2x2-maxpool matmul weight for 6x6/stride-2 patch rows."""
    w = np.asarray(w_oihw, dtype=np.float32)
    cout, cin = w.shape[0], w.shape[1]
    c, dy, dx = _patch_feature_map(cin, layout)
    big = np.zeros((cin * 36, 4 * LANE), dtype=np.float32)
    for j, (hr, wr) in enumerate(((0, 0), (0, 1), (1, 0), (1, 1))):
        kh, kw = dy - hr, dx - wr
        valid = (kh >= 0) & (kh < 5) & (kw >= 0) & (kw < 5)
        blk = w[:, c, np.clip(kh, 0, 4), np.clip(kw, 0, 4)] * valid[None, :]
        big[:, j * LANE:j * LANE + cout] = blk.T
    return jnp.asarray(big, dtype=jnp.bfloat16)


def _bias_pad(b, n):
    b = np.asarray(b, dtype=np.float32)
    return jnp.asarray(np.pad(b, (0, n - b.shape[0])).reshape(1, n))


def init_lenet_params(key, num_classes=10, dtype=jnp.float32):
    """Raw parameters in the PyTorch layouts of the reference module."""
    ks = jax.random.split(key, 10)
    s = 0.1
    return {
        "conv1_w": jax.random.normal(ks[0], (6, 3, 5, 5), dtype) * s,
        "conv1_b": jax.random.normal(ks[1], (6,), dtype) * s,
        "conv2_w": jax.random.normal(ks[2], (16, 6, 5, 5), dtype) * s,
        "conv2_b": jax.random.normal(ks[3], (16,), dtype) * s,
        "fc1_w": jax.random.normal(ks[4], (120, 16 * 5 * 5), dtype) * s,
        "fc1_b": jax.random.normal(ks[5], (120,), dtype) * s,
        "fc2_w": jax.random.normal(ks[6], (84, 120), dtype) * s,
        "fc2_b": jax.random.normal(ks[7], (84,), dtype) * s,
        "fc3_w": jax.random.normal(ks[8], (num_classes, 84), dtype) * s,
        "fc3_b": jax.random.normal(ks[9], (num_classes,), dtype) * s,
    }


def prepare_params(raw, num_classes):
    """One-time repack into the kernel layouts: fused conv+pool block weights,
    lane-padded (zero) fc weights transposed to (K, N), NHWC-flatten column
    reorder for fc1, bf16 matmul operands, f32 biases."""
    p = {}
    p["conv1_w"] = _build_conv_pool_weight(raw["conv1_w"], "NCHW")   # (108, 512)
    p["conv1_b"] = _bias_pad(raw["conv1_b"], LANE)
    p["conv2_w"] = _build_conv_pool_weight(raw["conv2_w"], "NHWC")   # (216, 512)
    p["conv2_b"] = _bias_pad(raw["conv2_b"], LANE)

    def pad2(a, rows, cols):
        a = np.asarray(a, dtype=np.float32)
        a = np.pad(a, ((0, rows - a.shape[0]), (0, cols - a.shape[1])))
        return jnp.asarray(a).astype(jnp.bfloat16)

    # fc1: reorder columns from PyTorch's (c, h, w) flatten to the on-device
    # NHWC (h, w, c) flatten, transpose to (K, N), pad N to 128 lanes.
    f1 = np.asarray(raw["fc1_w"], np.float32).reshape(120, 16, 5, 5)
    f1 = f1.transpose(0, 2, 3, 1).reshape(120, 400).T                # (400, 120)
    p["fc1_w"] = pad2(f1, 400, LANE)
    p["fc1_b"] = _bias_pad(raw["fc1_b"], LANE)

    p["fc2_w"] = pad2(np.asarray(raw["fc2_w"], np.float32).T, LANE, LANE)
    p["fc2_b"] = _bias_pad(raw["fc2_b"], LANE)

    n3 = _round_up(num_classes, LANE)
    p["fc3_w"] = pad2(np.asarray(raw["fc3_w"], np.float32).T, LANE, n3)
    p["fc3_b"] = _bias_pad(raw["fc3_b"], n3)
    return p


# ----------------------------------------------------------------------------
# LeNet forward
# ----------------------------------------------------------------------------
@functools.partial(jax.jit, static_argnames=("num_classes",))
def lenet_forward(params, x, *, num_classes):
    # x: (B, 3, 32, 32) NCHW float32 (PyTorch convention at the boundary).
    B = x.shape[0]
    xb = x.astype(jnp.bfloat16)

    # conv1 + ReLU + pool1, fused: one 6x6/stride-2 patch per pooled pixel.
    p1 = lax.conv_general_dilated_patches(
        xb, (6, 6), (2, 2), "VALID",
        dimension_numbers=("NCHW", "OIHW", "NHWC"))          # (B, 14, 14, 108)
    _, P1, Q1, K1 = p1.shape
    z1 = conv_pool(p1.reshape(B * P1 * Q1, K1),
                   params["conv1_w"], params["conv1_b"], c_out=6)
    z1 = z1.reshape(B, P1, Q1, 6)                             # (B,14,14,6) NHWC

    # conv2 + ReLU + pool2, fused.
    p2 = lax.conv_general_dilated_patches(
        z1, (6, 6), (2, 2), "VALID",
        dimension_numbers=("NHWC", "HWIO", "NHWC"))           # (B, 5, 5, 216)
    _, P2, Q2, K2 = p2.shape
    z2 = conv_pool(p2.reshape(B * P2 * Q2, K2),
                   params["conv2_w"], params["conv2_b"], c_out=16)  # (B*25, 16)

    # fused fc1 -> fc2 -> fc3 (NHWC flatten; fc1 columns reordered at init).
    feat = z2.reshape(B, P2 * Q2 * 16)                        # (B, 400) bf16
    logits = fc_fused(feat, params)                           # (B, 128) f32
    return logits[:, :num_classes]


# ----------------------------------------------------------------------------
# Plain-JAX f32 reference (mirrors the PyTorch module) for a sanity check
# ----------------------------------------------------------------------------
def lenet_reference(raw, x):
    def conv(x, w, b):
        y = lax.conv_general_dilated(
            x, w, (1, 1), "VALID",
            dimension_numbers=("NCHW", "OIHW", "NCHW"))
        return jax.nn.relu(y + b[None, :, None, None])

    def pool(x):
        return lax.reduce_window(x, -jnp.inf, lax.max,
                                 (1, 1, 2, 2), (1, 1, 2, 2), "VALID")

    x = pool(conv(x, raw["conv1_w"], raw["conv1_b"]))
    x = pool(conv(x, raw["conv2_w"], raw["conv2_b"]))
    x = x.reshape(x.shape[0], -1)
    x = jax.nn.relu(x @ raw["fc1_w"].T + raw["fc1_b"])
    x = jax.nn.relu(x @ raw["fc2_w"].T + raw["fc2_b"])
    return x @ raw["fc3_w"].T + raw["fc3_b"]


if __name__ == "__main__":
    num_classes = 10  # small deterministic config (module default is 1000)
    key = jax.random.PRNGKey(0)
    pkey, xkey = jax.random.split(key)
    raw = init_lenet_params(pkey, num_classes=num_classes)
    params = prepare_params(raw, num_classes)
    # LeNet's fc1 (16*5*5 inputs) implies 32x32 spatial input; batch kept small.
    x = jax.random.normal(xkey, (2, 3, 32, 32), jnp.float32)

    out = lenet_forward(params, x, num_classes=num_classes)
    jax.block_until_ready(out)
    assert out.shape == (2, num_classes) and out.dtype == jnp.float32

    ref = lenet_reference(raw, x)
    err = float(jnp.max(jnp.abs(out - ref)))
    # bf16 matmul operands / bf16 inter-layer activations -> loose tolerance.
    assert err < 0.5, f"mismatch vs f32 reference: max abs err {err}"

    print("KERNEL_OK")
</pallas_src>

<mosaic_0001>
module attributes {stable_mosaic.version = 11 : i64} {
  func.func @_conv_pool_kernel(%arg0: i32, %arg1: memref<200x108xbf16, #tpu.memory_space<vmem>>, %arg2: memref<108x512xbf16, #tpu.memory_space<vmem>>, %arg3: memref<1x128xf32, #tpu.memory_space<vmem>>, %arg4: memref<200x6xbf16, #tpu.memory_space<vmem>>) attributes {dimension_semantics = [#tpu.dimension_semantics<parallel>], iteration_bounds = array<i64: 2>, scalar_prefetch = 0 : i64, scratch_operands = 0 : i64, tpu.core_type = #tpu.core_type<tc>, window_params = [{transform_indices = @transform_0, window_bounds = array<i64: 200, 108>}, {pipeline_mode = #tpu.pipeline_mode<synchronous>, transform_indices = @transform_1, window_bounds = array<i64: 108, 512>}, {pipeline_mode = #tpu.pipeline_mode<synchronous>, transform_indices = @transform_2, window_bounds = array<i64: 1, 128>}, {transform_indices = @transform_3, window_bounds = array<i64: 200, 6>}]} {
    %c0 = arith.constant 0 : index
    %c0_0 = arith.constant 0 : index
    %0 = vector.load %arg1[%c0, %c0_0] : memref<200x108xbf16, #tpu.memory_space<vmem>>, vector<200x108xbf16>
    %c0_1 = arith.constant 0 : index
    %c0_2 = arith.constant 0 : index
    %1 = vector.load %arg2[%c0_1, %c0_2] : memref<108x512xbf16, #tpu.memory_space<vmem>>, vector<108x512xbf16>
    %cst = arith.constant dense<0.000000e+00> : vector<200x512xf32>
    %2 = tpu.matmul %0, %1, %cst {dimension_numbers = #tpu.dot_dimension_numbers<[1], [0], [0], [1], [0, 0, 1, 1], [], []>} : vector<200x108xbf16>, vector<108x512xbf16>, vector<200x512xf32> -> vector<200x512xf32>
    %3 = vector.extract_strided_slice %2 {offsets = [0, 0], sizes = [200, 128], strides = [1, 1]} : vector<200x512xf32> to vector<200x128xf32>
    %4 = vector.extract_strided_slice %2 {offsets = [0, 128], sizes = [200, 128], strides = [1, 1]} : vector<200x512xf32> to vector<200x128xf32>
    %5 = arith.maximumf %3, %4 : vector<200x128xf32>
    %6 = vector.extract_strided_slice %2 {offsets = [0, 256], sizes = [200, 128], strides = [1, 1]} : vector<200x512xf32> to vector<200x128xf32>
    %7 = vector.extract_strided_slice %2 {offsets = [0, 384], sizes = [200, 128], strides = [1, 1]} : vector<200x512xf32> to vector<200x128xf32>
    %8 = arith.maximumf %6, %7 : vector<200x128xf32>
    %9 = arith.maximumf %5, %8 : vector<200x128xf32>
    %c0_3 = arith.constant 0 : index
    %c0_4 = arith.constant 0 : index
    %10 = vector.load %arg3[%c0_3, %c0_4] : memref<1x128xf32, #tpu.memory_space<vmem>>, vector<1x128xf32>
    %11 = vector.broadcast %10 : vector<1x128xf32> to vector<200x128xf32>
    %12 = arith.addf %9, %11 : vector<200x128xf32>
    %cst_5 = arith.constant 0.000000e+00 : f32
    %13 = vector.broadcast %cst_5 : f32 to vector<200x128xf32>
    %14 = arith.maximumf %12, %13 : vector<200x128xf32>
    %15 = vector.extract_strided_slice %14 {offsets = [0, 0], sizes = [200, 6], strides = [1, 1]} : vector<200x128xf32> to vector<200x6xf32>
    %16 = arith.truncf %15 : vector<200x6xf32> to vector<200x6xbf16>
    %c0_6 = arith.constant 0 : index
    %c0_7 = arith.constant 0 : index
    %17 = vector.load %arg4[%c0_6, %c0_7] : memref<200x6xbf16, #tpu.memory_space<vmem>>, vector<200x6xbf16>
    tpu.vector_store %arg4[%c0_6, %c0_7], %16 {strides = array<i32>} : memref<200x6xbf16, #tpu.memory_space<vmem>>, vector<200x6xbf16>,
    return
  }
  func.func @transform_0(%arg0: i32) -> (i32, i32) {
    %c0_i32 = arith.constant 0 : i32
    %c0_i32_0 = arith.constant 0 : i32
    return %arg0, %c0_i32 : i32, i32
  }
  func.func @transform_1(%arg0: i32) -> (i32, i32) {
    %c0_i32 = arith.constant 0 : i32
    %c0_i32_0 = arith.constant 0 : i32
    %c0_i32_1 = arith.constant 0 : i32
    return %c0_i32, %c0_i32_0 : i32, i32
  }
  func.func @transform_2(%arg0: i32) -> (i32, i32) {
    %c0_i32 = arith.constant 0 : i32
    %c0_i32_0 = arith.constant 0 : i32
    %c0_i32_1 = arith.constant 0 : i32
    return %c0_i32, %c0_i32_0 : i32, i32
  }
  func.func @transform_3(%arg0: i32) -> (i32, i32) {
    %c0_i32 = arith.constant 0 : i32
    %c0_i32_0 = arith.constant 0 : i32
    return %arg0, %c0_i32 : i32, i32
  }
}

module attributes {stable_mosaic.version = 11 : i64} {
  func.func @_conv_pool_kernel(%arg0: i32, %arg1: memref<50x216xbf16, #tpu.memory_space<vmem>>, %arg2: memref<216x512xbf16, #tpu.memory_space<vmem>>, %arg3: memref<1x128xf32, #tpu.memory_space<vmem>>, %arg4: memref<50x16xbf16, #tpu.memory_space<vmem>>) attributes {dimension_semantics = [#tpu.dimension_semantics<parallel>], iteration_bounds = array<i64: 1>, scalar_prefetch = 0 : i64, scratch_operands = 0 : i64, tpu.core_type = #tpu.core_type<tc>, window_params = [{transform_indices = @transform_0, window_bounds = array<i64: 50, 216>}, {pipeline_mode = #tpu.pipeline_mode<synchronous>, transform_indices = @transform_1, window_bounds = array<i64: 216, 512>}, {pipeline_mode = #tpu.pipeline_mode<synchronous>, transform_indices = @transform_2, window_bounds = array<i64: 1, 128>}, {transform_indices = @transform_3, window_bounds = array<i64: 50, 16>}]} {
    %c0 = arith.constant 0 : index
    %c0_0 = arith.constant 0 : index
    %0 = vector.load %arg1[%c0, %c0_0] : memref<50x216xbf16, #tpu.memory_space<vmem>>, vector<50x216xbf16>
    %c0_1 = arith.constant 0 : index
    %c0_2 = arith.constant 0 : index
    %1 = vector.load %arg2[%c0_1, %c0_2] : memref<216x512xbf16, #tpu.memory_space<vmem>>, vector<216x512xbf16>
    %cst = arith.constant dense<0.000000e+00> : vector<50x512xf32>
    %2 = tpu.matmul %0, %1, %cst {dimension_numbers = #tpu.dot_dimension_numbers<[1], [0], [0], [1], [0, 0, 1, 1], [], []>} : vector<50x216xbf16>, vector<216x512xbf16>, vector<50x512xf32> -> vector<50x512xf32>
    %3 = vector.extract_strided_slice %2 {offsets = [0, 0], sizes = [50, 128], strides = [1, 1]} : vector<50x512xf32> to vector<50x128xf32>
    %4 = vector.extract_strided_slice %2 {offsets = [0, 128], sizes = [50, 128], strides = [1, 1]} : vector<50x512xf32> to vector<50x128xf32>
    %5 = arith.maximumf %3, %4 : vector<50x128xf32>
    %6 = vector.extract_strided_slice %2 {offsets = [0, 256], sizes = [50, 128], strides = [1, 1]} : vector<50x512xf32> to vector<50x128xf32>
    %7 = vector.extract_strided_slice %2 {offsets = [0, 384], sizes = [50, 128], strides = [1, 1]} : vector<50x512xf32> to vector<50x128xf32>
    %8 = arith.maximumf %6, %7 : vector<50x128xf32>
    %9 = arith.maximumf %5, %8 : vector<50x128xf32>
    %c0_3 = arith.constant 0 : index
    %c0_4 = arith.constant 0 : index
    %10 = vector.load %arg3[%c0_3, %c0_4] : memref<1x128xf32, #tpu.memory_space<vmem>>, vector<1x128xf32>
    %11 = vector.broadcast %10 : vector<1x128xf32> to vector<50x128xf32>
    %12 = arith.addf %9, %11 : vector<50x128xf32>
    %cst_5 = arith.constant 0.000000e+00 : f32
    %13 = vector.broadcast %cst_5 : f32 to vector<50x128xf32>
    %14 = arith.maximumf %12, %13 : vector<50x128xf32>
    %15 = vector.extract_strided_slice %14 {offsets = [0, 0], sizes = [50, 16], strides = [1, 1]} : vector<50x128xf32> to vector<50x16xf32>
    %16 = arith.truncf %15 : vector<50x16xf32> to vector<50x16xbf16>
    %c0_6 = arith.constant 0 : index
    %c0_7 = arith.constant 0 : index
    %17 = vector.load %arg4[%c0_6, %c0_7] : memref<50x16xbf16, #tpu.memory_space<vmem>>, vector<50x16xbf16>
    tpu.vector_store %arg4[%c0_6, %c0_7], %16 {strides = array<i32>} : memref<50x16xbf16, #tpu.memory_space<vmem>>, vector<50x16xbf16>,
    return
  }
  func.func @transform_0(%arg0: i32) -> (i32, i32) {
    %c0_i32 = arith.constant 0 : i32
    %c0_i32_0 = arith.constant 0 : i32
    return %arg0, %c0_i32 : i32, i32
  }
  func.func @transform_1(%arg0: i32) -> (i32, i32) {
    %c0_i32 = arith.constant 0 : i32
    %c0_i32_0 = arith.constant 0 : i32
    %c0_i32_1 = arith.constant 0 : i32
    return %c0_i32, %c0_i32_0 : i32, i32
  }
  func.func @transform_2(%arg0: i32) -> (i32, i32) {
    %c0_i32 = arith.constant 0 : i32
    %c0_i32_0 = arith.constant 0 : i32
    %c0_i32_1 = arith.constant 0 : i32
    return %c0_i32, %c0_i32_0 : i32, i32
  }
  func.func @transform_3(%arg0: i32) -> (i32, i32) {
    %c0_i32 = arith.constant 0 : i32
    %c0_i32_0 = arith.constant 0 : i32
    return %arg0, %c0_i32 : i32, i32
  }
}

module attributes {stable_mosaic.version = 11 : i64} {
  func.func @_fc_fused_kernel(%arg0: i32, %arg1: memref<2x400xbf16, #tpu.memory_space<vmem>>, %arg2: memref<400x128xbf16, #tpu.memory_space<vmem>>, %arg3: memref<1x128xf32, #tpu.memory_space<vmem>>, %arg4: memref<128x128xbf16, #tpu.memory_space<vmem>>, %arg5: memref<1x128xf32, #tpu.memory_space<vmem>>, %arg6: memref<128x128xbf16, #tpu.memory_space<vmem>>, %arg7: memref<1x128xf32, #tpu.memory_space<vmem>>, %arg8: memref<2x128xf32, #tpu.memory_space<vmem>>) attributes {dimension_semantics = [#tpu.dimension_semantics<parallel>], iteration_bounds = array<i64: 1>, scalar_prefetch = 0 : i64, scratch_operands = 0 : i64, tpu.core_type = #tpu.core_type<tc>, window_params = [{transform_indices = @transform_0, window_bounds = array<i64: 2, 400>}, {pipeline_mode = #tpu.pipeline_mode<synchronous>, transform_indices = @transform_1, window_bounds = array<i64: 400, 128>}, {pipeline_mode = #tpu.pipeline_mode<synchronous>, transform_indices = @transform_2, window_bounds = array<i64: 1, 128>}, {pipeline_mode = #tpu.pipeline_mode<synchronous>, transform_indices = @transform_3, window_bounds = array<i64: 128, 128>}, {pipeline_mode = #tpu.pipeline_mode<synchronous>, transform_indices = @transform_4, window_bounds = array<i64: 1, 128>}, {pipeline_mode = #tpu.pipeline_mode<synchronous>, transform_indices = @transform_5, window_bounds = array<i64: 128, 128>}, {pipeline_mode = #tpu.pipeline_mode<synchronous>, transform_indices = @transform_6, window_bounds = array<i64: 1, 128>}, {transform_indices = @transform_7, window_bounds = array<i64: 2, 128>}]} {
    %c0 = arith.constant 0 : index
    %c0_0 = arith.constant 0 : index
    %0 = vector.load %arg1[%c0, %c0_0] : memref<2x400xbf16, #tpu.memory_space<vmem>>, vector<2x400xbf16>
    %c0_1 = arith.constant 0 : index
    %c0_2 = arith.constant 0 : index
    %1 = vector.load %arg2[%c0_1, %c0_2] : memref<400x128xbf16, #tpu.memory_space<vmem>>, vector<400x128xbf16>
    %cst = arith.constant dense<0.000000e+00> : vector<2x128xf32>
    %2 = tpu.matmul %0, %1, %cst {dimension_numbers = #tpu.dot_dimension_numbers<[1], [0], [0], [1], [0, 0, 1, 1], [], []>} : vector<2x400xbf16>, vector<400x128xbf16>, vector<2x128xf32> -> vector<2x128xf32>
    %c0_3 = arith.constant 0 : index
    %c0_4 = arith.constant 0 : index
    %3 = vector.load %arg3[%c0_3, %c0_4] : memref<1x128xf32, #tpu.memory_space<vmem>>, vector<1x128xf32>
    %4 = vector.broadcast %3 : vector<1x128xf32> to vector<2x128xf32>
    %5 = arith.addf %2, %4 : vector<2x128xf32>
    %cst_5 = arith.constant 0.000000e+00 : f32
    %6 = vector.broadcast %cst_5 : f32 to vector<2x128xf32>
    %7 = arith.maximumf %5, %6 : vector<2x128xf32>
    %8 = arith.truncf %7 : vector<2x128xf32> to vector<2x128xbf16>
    %c0_6 = arith.constant 0 : index
    %c0_7 = arith.constant 0 : index
    %9 = vector.load %arg4[%c0_6, %c0_7] : memref<128x128xbf16, #tpu.memory_space<vmem>>, vector<128x128xbf16>
    %cst_8 = arith.constant dense<0.000000e+00> : vector<2x128xf32>
    %10 = tpu.matmul %8, %9, %cst_8 {dimension_numbers = #tpu.dot_dimension_numbers<[1], [0], [0], [1], [0, 0, 1, 1], [], []>} : vector<2x128xbf16>, vector<128x128xbf16>, vector<2x128xf32> -> vector<2x128xf32>
    %c0_9 = arith.constant 0 : index
    %c0_10 = arith.constant 0 : index
    %11 = vector.load %arg5[%c0_9, %c0_10] : memref<1x128xf32, #tpu.memory_space<vmem>>, vector<1x128xf32>
    %12 = vector.broadcast %11 : vector<1x128xf32> to vector<2x128xf32>
    %13 = arith.addf %10, %12 : vector<2x128xf32>
    %cst_11 = arith.constant 0.000000e+00 : f32
    %14 = vector.broadcast %cst_11 : f32 to vector<2x128xf32>
    %15 = arith.maximumf %13, %14 : vector<2x128xf32>
    %16 = arith.truncf %15 : vector<2x128xf32> to vector<2x128xbf16>
    %c0_12 = arith.constant 0 : index
    %c0_13 = arith.constant 0 : index
    %17 = vector.load %arg6[%c0_12, %c0_13] : memref<128x128xbf16, #tpu.memory_space<vmem>>, vector<128x128xbf16>
    %cst_14 = arith.constant dense<0.000000e+00> : vector<2x128xf32>
    %18 = tpu.matmul %16, %17, %cst_14 {dimension_numbers = #tpu.dot_dimension_numbers<[1], [0], [0], [1], [0, 0, 1, 1], [], []>} : vector<2x128xbf16>, vector<128x128xbf16>, vector<2x128xf32> -> vector<2x128xf32>
    %c0_15 = arith.constant 0 : index
    %c0_16 = arith.constant 0 : index
    %19 = vector.load %arg7[%c0_15, %c0_16] : memref<1x128xf32, #tpu.memory_space<vmem>>, vector<1x128xf32>
    %20 = vector.broadcast %19 : vector<1x128xf32> to vector<2x128xf32>
    %21 = arith.addf %18, %20 : vector<2x128xf32>
    %c0_17 = arith.constant 0 : index
    %c0_18 = arith.constant 0 : index
    %22 = vector.load %arg8[%c0_17, %c0_18] : memref<2x128xf32, #tpu.memory_space<vmem>>, vector<2x128xf32>
    tpu.vector_store %arg8[%c0_17, %c0_18], %21 {strides = array<i32>} : memref<2x128xf32, #tpu.memory_space<vmem>>, vector<2x128xf32>,
    return
  }
  func.func @transform_0(%arg0: i32) -> (i32, i32) {
    %c0_i32 = arith.constant 0 : i32
    %c0_i32_0 = arith.constant 0 : i32
    return %arg0, %c0_i32 : i32, i32
  }
  func.func @transform_1(%arg0: i32) -> (i32, i32) {
    %c0_i32 = arith.constant 0 : i32
    %c0_i32_0 = arith.constant 0 : i32
    %c0_i32_1 = arith.constant 0 : i32
    return %c0_i32, %c0_i32_0 : i32, i32
  }
  func.func @transform_2(%arg0: i32) -> (i32, i32) {
    %c0_i32 = arith.constant 0 : i32
    %c0_i32_0 = arith.constant 0 : i32
    %c0_i32_1 = arith.constant 0 : i32
    return %c0_i32, %c0_i32_0 : i32, i32
  }
  func.func @transform_3(%arg0: i32) -> (i32, i32) {
    %c0_i32 = arith.constant 0 : i32
    %c0_i32_0 = arith.constant 0 : i32
    %c0_i32_1 = arith.constant 0 : i32
    return %c0_i32, %c0_i32_0 : i32, i32
  }
  func.func @transform_4(%arg0: i32) -> (i32, i32) {
    %c0_i32 = arith.constant 0 : i32
    %c0_i32_0 = arith.constant 0 : i32
    %c0_i32_1 = arith.constant 0 : i32
    return %c0_i32, %c0_i32_0 : i32, i32
  }
  func.func @transform_5(%arg0: i32) -> (i32, i32) {
    %c0_i32 = arith.constant 0 : i32
    %c0_i32_0 = arith.constant 0 : i32
    %c0_i32_1 = arith.constant 0 : i32
    return %c0_i32, %c0_i32_0 : i32, i32
  }
  func.func @transform_6(%arg0: i32) -> (i32, i32) {
    %c0_i32 = arith.constant 0 : i32
    %c0_i32_0 = arith.constant 0 : i32
    %c0_i32_1 = arith.constant 0 : i32
    return %c0_i32, %c0_i32_0 : i32, i32
  }
  func.func @transform_7(%arg0: i32) -> (i32, i32) {
    %c0_i32 = arith.constant 0 : i32
    %c0_i32_0 = arith.constant 0 : i32
    return %arg0, %c0_i32 : i32, i32
  }
}

</mosaic_0001>

<bundles_post_ra>
// kernel: lenet_forward.3
= control target key start
LH: loop header
LB: loop body
LE: loop exit
PB: predicated region body
PF: predicated region fallthrough
CT: control target
= control target key end

     0   :  { %s1788_s12 = smov 0   ;;  %s1790_s13 = smov 0   ;;  %s2175_s0 = inlined_call_operand.vmem [shape: bf16[392,108], index: 0, kind: input, shape index: {}]   ;;  %s2176_s1 = inlined_call_operand.vmem [shape: bf16[108,512], index: 1, kind: input, shape index: {}]   ;;  %s2177_s2 = inlined_call_operand.vmem [shape: f32[1,128], index: 2, kind: input, shape index: {}]   ;;  %s2178_s3 = inlined_call_operand.vmem [shape: bf16[392,6], index: 3, kind: output, shape index: {}]  }
   0x1   :  { %s1792_s14 = smov 0  }
   0x2 LB: > { %s1801_s15 = sadd.s32 4294967295, %s1733_s14   ;;  %s1803_s16 = sadd.s32 1, %s1733_s14   ;;  %s1733_s14 = sphi %s1792_s14, %s2185_s14   ;;  %s1729_s13 = sphi %s1790_s13, %s2184_s13   ;;  %s1725_s12 = sphi %s1788_s12, %s2183_s12  }
   0x3   : > { %s85_s17 = ssub.s32 %s1733_s14, %s1803_s16  ;;  %s88_s18 = sadd.s32 1, %s1729_s13 }
   0x4   : > { %p86_p0 = scmp.eq.s32.totalorder %s85_s17, 0  ;;  %p98_p1 = scmp.ne.s32.totalorder %s1729_s13, %s1725_s12 }
   0x5   : > { %p99_p2 = scmp.eq.s32.totalorder %s1801_s15, 1  ;;  %p1394_p3 = scmp.ge.s32.totalorder %s1733_s14, 1 }
   0x6   : > { %s1811_s19 = scalar_select %p86_p0, %s1729_s13, %s88_s18  }
   0x7   : > { %p1813_p4 = por %p99_p2, %p98_p1  ;;  %p146_p5 = scmp.lt.s32.totalorder %s1733_s14, 3 }
   0x9   : > { %p147_p6 = pnand %p1394_p3, %p146_p5 }
   0xa   : > { %v1620_v0 = vld [vmem:[%s2176_s1 + $0x4] ss:$16 sps:$4 sm:$0xff] (!%p147_p6)   ;;  %v1622_v1 = vld [vmem:[%s2176_s1 + $0xc] ss:$16 sps:$4 sm:$0xff] (!%p147_p6)   ;;  %v1767_v2 = vmov (!%p147_p6), 0   ;;  %s1832_s29 = smul.u32 (!%p147_p6), 25, %s1801_s15 }
   0xb   : > { %150 = sbr.rel (%p147_p6) target bundleno = 438 (0x1b6), region = 32  ;;  %530 = vmatprep.mubr.bf16.mxu0 (!%p147_p6), %v1767_v2  ;;  %691 = vmatprep.mubr.bf16.mxu1 (!%p147_p6), %v1767_v2  ;;  %v1624_v3 = vld [vmem:[%s2176_s1] ss:$16 sps:$4 sm:$0xff] (!%p147_p6)   ;;  %v1625_v4 = vld [vmem:[%s2176_s1 + $0x8] ss:$16 sps:$4 sm:$0xff] (!%p147_p6)   ;;  %vm485_vm0 = vcmask (!%p147_p6), 1045504  }
   0xc   : > { %498 = vmatprep.subr.bf16.mxu0 (!%p147_p6), %v1620_v0  ;;  %659 = vmatprep.subr.bf16.mxu1 (!%p147_p6), %v1622_v1  ;;  %v1626_v5 = vld [vmem:[%s2176_s1 + $0x24] ss:$16 sps:$4 sm:$0xff] (!%p147_p6)   ;;  %v1628_v6 = vld [vmem:[%s2176_s1 + $0x2c] ss:$16 sps:$4 sm:$0xff] (!%p147_p6)   ;;  %v1630_v7 = vld [vmem:[%s2176_s1 + $0x20] ss:$16 sps:$4 sm:$0xff] (!%p147_p6)  }
   0xd   : > { %499 = vmatpush1.bf16.msra.mxu0 (!%p147_p6), %v1624_v3  ;;  %660 = vmatpush1.bf16.msra.mxu1 (!%p147_p6), %v1625_v4  ;;  %v1631_v8 = vld [vmem:[%s2176_s1 + $0x28] ss:$16 sps:$4 sm:$0xff] (!%p147_p6)   ;;  %v1632_v9 = vld [vmem:[%s2176_s1 + $0x44] ss:$16 sps:$4 sm:$0xff] (!%p147_p6)   ;;  %p178_p7 = scmp.lt.s32.totalorder (!%p147_p6), %s1832_s29, 48  ;;  %vm445_vm1 = vcmask (!%p147_p6), 883712  }
   0xe   : > { %500 = vmatprep.subr.bf16.mxu0 (!%p147_p6), %v1626_v5  ;;  %661 = vmatprep.subr.bf16.mxu1 (!%p147_p6), %v1628_v6  ;;  %v1634_v10 = vld [vmem:[%s2176_s1 + $0x4c] ss:$16 sps:$4 sm:$0xff] (!%p147_p6)   ;;  %v1636_v11 = vld [vmem:[%s2176_s1 + $0x40] ss:$16 sps:$4 sm:$0xff] (!%p147_p6)   ;;  %v1637_v12 = vld [vmem:[%s2176_s1 + $0x48] ss:$16 sps:$4 sm:$0xff] (!%p147_p6)  }
   0xf   : > { %v1638_v13 = vld [vmem:[%s2176_s1 + $0x64] ss:$16 sps:$4 sm:$0xff] (!%p147_p6)   ;;  %v1640_v14 = vld [vmem:[%s2176_s1 + $0x6c] ss:$16 sps:$4 sm:$0xff] (!%p147_p6)   ;;  %v1642_v15 = vld [vmem:[%s2176_s1 + $0x60] ss:$16 sps:$4 sm:$0xff] (!%p147_p6)  }
  0x10   : > { %v1643_v16 = vld [vmem:[%s2176_s1 + $0x68] ss:$16 sps:$4 sm:$0xff] (!%p147_p6)   ;;  %v1644_v17 = vld [vmem:[%s2176_s1 + $0x84] ss:$16 sps:$4 sm:$0xff] (!%p147_p6)   ;;  %v1646_v18 = vld [vmem:[%s2176_s1 + $0x8c] ss:$16 sps:$4 sm:$0xff] (!%p147_p6)  }
  0x11   : > { %501 = vmatpush1.bf16.msra.mxu0 (!%p147_p6), %v1630_v7  ;;  %662 = vmatpush1.bf16.msra.mxu1 (!%p147_p6), %v1631_v8  ;;  %v1648_v19 = vld [vmem:[%s2176_s1 + $0x80] ss:$16 sps:$4 sm:$0xff] (!%p147_p6)   ;;  %v1649_v20 = vld [vmem:[%s2176_s1 + $0x88] ss:$16 sps:$4 sm:$0xff] (!%p147_p6)   ;;  %v1650_v21 = vld [vmem:[%s2176_s1 + $0xa4] ss:$16 sps:$4 sm:$0xff] (!%p147_p6)  }
  0x12   : > { %502 = vmatprep.subr.bf16.mxu0 %v1632_v9  ;;  %663 = vmatprep.subr.bf16.mxu1 %v1634_v10  ;;  %s179_s5 = scalar_select %p178_p7, %s1832_s29, 48  ;;  %v1652_v22 = vld [vmem:[%s2176_s1 + $0xac] ss:$16 sps:$4 sm:$0xff]   ;;  %v1654_v23 = vld [vmem:[%s2176_s1 + $0xa0] ss:$16 sps:$4 sm:$0xff]   ;;  %vm1053_vm2 = vcmask 44032  }
  0x13   : > { %v1656_v24 = vld [vmem:[%s2176_s1 + $0xc4] ss:$16 sps:$4 sm:$0x3f]   ;;  %v1658_v25 = vld [vmem:[%s2176_s1 + $0xcc] ss:$16 sps:$4 sm:$0x3f]  }
  0x14   : > { %s1395_s22 = sshll.u32 %s179_s5, 2  ;;  %v1660_v26 = vld [vmem:[%s2176_s1 + $0xc0] ss:$16 sps:$4 sm:$0x3f]   ;;  %v1655_v28 = vld [vmem:[%s2176_s1 + $0xa8] ss:$16 sps:$4 sm:$0xff]  }
  0x15   : > { %503 = vmatpush1.bf16.msra.mxu0 %v1636_v11  ;;  %664 = vmatpush1.bf16.msra.mxu1 %v1637_v12  ;;  %s1893_s30 = scalar_lea.vmem %s2175_s0, %s1395_s22  ;;  %v1661_v27 = vld [vmem:[%s2176_s1 + $0xc8] ss:$16 sps:$4 sm:$0x3f]   ;;  %v487_v29 = vsel %vm485_vm0, %v1660_v26, 0  ;;  %s170_s22 = sand.u32 1, %s1725_s12  }
  0x16   : > { %504 = vmatprep.subr.bf16.mxu0 %v1638_v13  ;;  %665 = vmatprep.subr.bf16.mxu1 %v1640_v14  ;;  %v493_v30 = vsel %vm485_vm0, %v1661_v27, 0  ;;  %v1662_v31 = vld [vmem:[%s1893_s30] sm:$0xff]   ;;  %v1663_v32 = vld [vmem:[%s1893_s30 + $0x8] sm:$0xff]   ;;  %v1664_v33 = vld [vmem:[%s1893_s30 + $0x10] sm:$0xff]   ;;  %s1529_s25 = smul.u32 100, %s170_s22  ;;  %s1087_s26 = ssub.s32 (%p1813_p4), 49, %s1832_s29 }
  0x17   : > { %v1665_v34 = vld [vmem:[%s1893_s30 + $0x18] sm:$0xff]   ;;  %v1666_v35 = vld [vmem:[%s1893_s30 + $0x20] sm:$0xff]   ;;  %v1667_v36 = vld [vmem:[%s1893_s30 + $0x28] sm:$0xff]   ;;  %s1528_s27 = smul.u32 (%p1813_p4), 100, %s1801_s15  ;;  %p1088_p8 = scmp.lt.s32.totalorder (%p1813_p4), %s1087_s26, 25 }
  0x18   : > { %v1668_v37 = vld [vmem:[%s1893_s30 + $0x30] sm:$0xff]   ;;  %v1669_v38 = vld [vmem:[%s1893_s30 + $0x38] sm:$0xff]   ;;  %v1670_v39 = vld [vmem:[%s1893_s30 + $0x40] sm:$0xff]   ;;  %s1984_s12 = scalar_lea.vmem [#allocation2], %s1529_s25  }
  0x19   : > { %505 = vmatpush1.bf16.msra.mxu0 %v1642_v15  ;;  %666 = vmatpush1.bf16.msra.mxu1 %v1643_v16  ;;  %v1671_v40 = vld [vmem:[%s1893_s30 + $0x48] sm:$0xff]   ;;  %v1672_v41 = vld [vmem:[%s1893_s30 + $0x50] sm:$0xff]   ;;  %v1673_v42 = vld [vmem:[%s1893_s30 + $0x58] sm:$0xff]   ;;  %s2066_s4 = scalar_lea.vmem (%p1813_p4), %s2178_s3, %s1528_s27  }
  0x1a   : > { %506 = vmatprep.subr.bf16.mxu0 %v1644_v17  ;;  %667 = vmatprep.subr.bf16.mxu1 %v1646_v18  ;;  %v1674_v43 = vld [vmem:[%s1893_s30 + $0x60] ss:$0 sps:$4 sm:$0xff]  }
  0x1b   : > { %v1980_v52 = vld [vmem:[%s2177_s2] ss:$0 sm:$0xff] }
  0x1d   : > { %507 = vmatpush1.bf16.msra.mxu0 %v1648_v19  ;;  %668 = vmatpush1.bf16.msra.mxu1 %v1649_v20 }
  0x1e   : > { %508 = vmatprep.subr.bf16.mxu0 %v1650_v21  ;;  %669 = vmatprep.subr.bf16.mxu1 %v1652_v22 }
  0x21   : > { %509 = vmatpush1.bf16.msra.mxu0 %v1654_v23  ;;  %670 = vmatpush1.bf16.msra.mxu1 %v1655_v28 }
  0x22   : > { %1437 = vmatprep.subr.msk.bf16.mxu0 %vm485_vm0, %v1656_v24  ;;  %1451 = vmatprep.subr.msk.bf16.mxu1 %vm485_vm0, %v1658_v25 }
  0x25   : > { %511 = vmatpush1.bf16.msra.mxu0 %v487_v29  ;;  %672 = vmatpush1.bf16.msra.mxu1 %v493_v30 }
  0x28   : > { %1438 = vmatmul.mubr.msk.bf16.vlgmr.msra.gmra.mrb[0].mxu0 %vm445_vm1, %v1662_v31  ;;  %1452 = vmatmul.mubr.msk.bf16.vlgmr.msra.gmra.mrb[0].mxu1 %vm445_vm1, %v1662_v31 }
  0x29   : > { %540 = vmatprep.mubr.bf16.mxu0 %v1767_v2  ;;  %701 = vmatprep.mubr.bf16.mxu1 %v1767_v2 }
  0x30   : > { %1439 = vmatmul.mubr.msk.bf16.gmra.mrb[4].mxu0 %vm445_vm1, %v1663_v32  ;;  %1453 = vmatmul.mubr.msk.bf16.gmra.mrb[4].mxu1 %vm445_vm1, %v1663_v32 }
  0x31   : > { %550 = vmatprep.mubr.bf16.mxu0 %v1767_v2  ;;  %711 = vmatprep.mubr.bf16.mxu1 %v1767_v2 }
  0x38   : > { %1440 = vmatmul.mubr.msk.bf16.gmra.mrb[8].mxu0 %vm445_vm1, %v1664_v33  ;;  %1454 = vmatmul.mubr.msk.bf16.gmra.mrb[8].mxu1 %vm445_vm1, %v1664_v33 }
  0x39   : > { %560 = vmatprep.mubr.bf16.mxu0 %v1767_v2  ;;  %721 = vmatprep.mubr.bf16.mxu1 %v1767_v2 }
  0x40   : > { %1441 = vmatmul.mubr.msk.bf16.gmra.mrb[12].mxu0 %vm445_vm1, %v1665_v34  ;;  %1455 = vmatmul.mubr.msk.bf16.gmra.mrb[12].mxu1 %vm445_vm1, %v1665_v34 }
  0x41   : > { %570 = vmatprep.mubr.bf16.mxu0 %v1767_v2  ;;  %731 = vmatprep.mubr.bf16.mxu1 %v1767_v2 }
  0x48   : > { %1442 = vmatmul.mubr.msk.bf16.gmra.mrb[16].mxu0 %vm445_vm1, %v1666_v35  ;;  %1456 = vmatmul.mubr.msk.bf16.gmra.mrb[16].mxu1 %vm445_vm1, %v1666_v35 }
  0x49   : > { %580 = vmatprep.mubr.bf16.mxu0 %v1767_v2  ;;  %741 = vmatprep.mubr.bf16.mxu1 %v1767_v2 }
  0x50   : > { %1443 = vmatmul.mubr.msk.bf16.gmra.mrb[20].mxu0 %vm445_vm1, %v1667_v36  ;;  %1457 = vmatmul.mubr.msk.bf16.gmra.mrb[20].mxu1 %vm445_vm1, %v1667_v36 }
  0x51   : > { %590 = vmatprep.mubr.bf16.mxu0 %v1767_v2  ;;  %751 = vmatprep.mubr.bf16.mxu1 %v1767_v2 }
  0x58   : > { %1444 = vmatmul.mubr.msk.bf16.gmra.mrb[24].mxu0 %vm445_vm1, %v1668_v37  ;;  %1458 = vmatmul.mubr.msk.bf16.gmra.mrb[24].mxu1 %vm445_vm1, %v1668_v37 }
  0x59   : > { %600 = vmatprep.mubr.bf16.mxu0 %v1767_v2  ;;  %761 = vmatprep.mubr.bf16.mxu1 %v1767_v2 }
  0x60   : > { %1445 = vmatmul.mubr.msk.bf16.gmra.mrb[28].mxu0 %vm445_vm1, %v1669_v38  ;;  %1459 = vmatmul.mubr.msk.bf16.gmra.mrb[28].mxu1 %vm445_vm1, %v1669_v38 }
  0x61   : > { %610 = vmatprep.mubr.bf16.mxu0 %v1767_v2  ;;  %771 = vmatprep.mubr.bf16.mxu1 %v1767_v2 }
  0x68   : > { %1446 = vmatmul.mubr.msk.bf16.gmra.mrb[32].mxu0 %vm445_vm1, %v1670_v39  ;;  %1460 = vmatmul.mubr.msk.bf16.gmra.mrb[32].mxu1 %vm445_vm1, %v1670_v39 }
  0x69   : > { %620 = vmatprep.mubr.bf16.mxu0 %v1767_v2  ;;  %781 = vmatprep.mubr.bf16.mxu1 %v1767_v2 }
  0x70   : > { %1447 = vmatmul.mubr.msk.bf16.gmra.mrb[36].mxu0 %vm445_vm1, %v1671_v40  ;;  %1461 = vmatmul.mubr.msk.bf16.gmra.mrb[36].mxu1 %vm445_vm1, %v1671_v40 }
  0x71   : > { %630 = vmatprep.mubr.bf16.mxu0 %v1767_v2  ;;  %791 = vmatprep.mubr.bf16.mxu1 %v1767_v2 }
  0x78   : > { %1448 = vmatmul.mubr.msk.bf16.gmra.mrb[40].mxu0 %vm445_vm1, %v1672_v41  ;;  %1462 = vmatmul.mubr.msk.bf16.gmra.mrb[40].mxu1 %vm445_vm1, %v1672_v41 }
  0x79   : > { %640 = vmatprep.mubr.bf16.mxu0 %v1767_v2  ;;  %801 = vmatprep.mubr.bf16.mxu1 %v1767_v2 }
  0x80   : > { %1449 = vmatmul.mubr.msk.bf16.gmra.mrb[44].mxu0 %vm445_vm1, %v1673_v42  ;;  %1463 = vmatmul.mubr.msk.bf16.gmra.mrb[44].mxu1 %vm445_vm1, %v1673_v42 }
  0x81   : > { %650 = vmatprep.mubr.bf16.mxu0 %v1767_v2  ;;  %811 = vmatprep.mubr.bf16.mxu1 %v1767_v2 }
  0x88   : > { %1450 = vmatmul.mubr.msk.bf16.gmra.mrb[48].mxu0 %vm445_vm1, %v1674_v43  ;;  %1464 = vmatmul.mubr.msk.bf16.gmra.mrb[48].mxu1 %vm445_vm1, %v1674_v43 }
  0xfb   : > { %v532_v44 = vpop.f32.mrb[0].mxu0  ;;  %v693_v45 = vpop.f32.mrb[0].mxu1 }
  0xfc   : > { %v534_v46 = vpop.f32.mrb[1].mxu0  ;;  %v695_v47 = vpop.f32.mrb[1].mxu1 }
  0xfd   : > { %v820_v48 = vmax.f32 %v532_v44, %v534_v46  ;;  %v845_v49 = vmax.f32 %v693_v45, %v695_v47  ;;  %v536_v50 = vpop.f32.mrb[2].mxu0  ;;  %v697_v51 = vpop.f32.mrb[2].mxu1 }
  0xfe   : > { %v538_v53 = vpop.f32.mrb[3].mxu0  ;;  %v699_v54 = vpop.f32.mrb[3].mxu1 }
  0xff   : > { %v870_v55 = vmax.f32 %v820_v48, %v845_v49  ;;  %v821_v56 = vmax.f32 %v536_v50, %v538_v53  ;;  %v846_v57 = vmax.f32 %v697_v51, %v699_v54 }
 0x101   : > { %v902_v58 = vadd.f32 %v1980_v52, %v870_v55  ;;  %v871_v59 = vmax.f32 %v821_v56, %v846_v57 }
 0x103   : > { %v927_v60 = vmax.f32 %v902_v58, 0.0  ;;  %v903_v61 = vadd.f32 %v1980_v52, %v871_v59  ;;  %v542_v62 = vpop.f32.mrb[4].mxu0  ;;  %v703_v63 = vpop.f32.mrb[4].mxu1 }
 0x104   : > { %v544_v0 = vpop.f32.mrb[5].mxu0  ;;  %v705_v1 = vpop.f32.mrb[5].mxu1 }
 0x105   : > { %v1503_v2 = vpack.c.bf16 %v927_v60, %v927_v60  ;;  %v928_v3 = vmax.f32 %v903_v61, 0.0  ;;  %v822_v4 = vmax.f32 %v542_v62, %v544_v0  ;;  %v847_v5 = vmax.f32 %v703_v63, %v705_v1  ;;  %v546_v6 = vpop.f32.mrb[6].mxu0  ;;  %v707_v7 = vpop.f32.mrb[6].mxu1 }
 0x106   : > { %v548_v8 = vpop.f32.mrb[7].mxu0  ;;  %v709_v9 = vpop.f32.mrb[7].mxu1 }
 0x107   : > { %1054 = vst.msk [vmem:[%s1984_s12] sm:$0xf] %vm1053_vm2, %v1503_v2  ;;  %v1504_v10 = vpack.c.bf16 %v928_v3, %v928_v3  ;;  %v872_v11 = vmax.f32 %v822_v4, %v847_v5  ;;  %v823_v12 = vmax.f32 %v546_v6, %v548_v8  ;;  %v848_v13 = vmax.f32 %v707_v7, %v709_v9 }
 0x109   : > { %1055 = vst.msk [vmem:[%s1984_s12 + $0x4] sm:$0xf] %vm1053_vm2, %v1504_v10  ;;  %v904_v14 = vadd.f32 %v1980_v52, %v872_v11  ;;  %v873_v15 = vmax.f32 %v823_v12, %v848_v13 }
 0x10b   : > { %v929_v16 = vmax.f32 %v904_v14, 0.0  ;;  %v905_v17 = vadd.f32 %v1980_v52, %v873_v15  ;;  %v552_v18 = vpop.f32.mrb[8].mxu0  ;;  %v713_v19 = vpop.f32.mrb[8].mxu1 }
 0x10c   : > { %v554_v20 = vpop.f32.mrb[9].mxu0  ;;  %v715_v21 = vpop.f32.mrb[9].mxu1 }
 0x10d   : > { %v1505_v22 = vpack.c.bf16 %v929_v16, %v929_v16  ;;  %v930_v23 = vmax.f32 %v905_v17, 0.0  ;;  %v824_v24 = vmax.f32 %v552_v18, %v554_v20  ;;  %v849_v25 = vmax.f32 %v713_v19, %v715_v21  ;;  %v556_v26 = vpop.f32.mrb[10].mxu0  ;;  %v717_v27 = vpop.f32.mrb[10].mxu1 }
 0x10e   : > { %v558_v28 = vpop.f32.mrb[11].mxu0  ;;  %v719_v29 = vpop.f32.mrb[11].mxu1 }
 0x10f   : > { %1056 = vst.msk [vmem:[%s1984_s12 + $0x8] sm:$0xf] %vm1053_vm2, %v1505_v22  ;;  %v1506_v30 = vpack.c.bf16 %v930_v23, %v930_v23  ;;  %v874_v31 = vmax.f32 %v824_v24, %v849_v25  ;;  %v825_v32 = vmax.f32 %v556_v26, %v558_v28  ;;  %v850_v33 = vmax.f32 %v717_v27, %v719_v29 }
 0x111   : > { %1057 = vst.msk [vmem:[%s1984_s12 + $0xc] sm:$0xf] %vm1053_vm2, %v1506_v30  ;;  %v906_v34 = vadd.f32 %v1980_v52, %v874_v31  ;;  %v875_v35 = vmax.f32 %v825_v32, %v850_v33 }
 0x113   : > { %v931_v36 = vmax.f32 %v906_v34, 0.0  ;;  %v907_v37 = vadd.f32 %v1980_v52, %v875_v35  ;;  %v562_v38 = vpop.f32.mrb[12].mxu0  ;;  %v723_v39 = vpop.f32.mrb[12].mxu1 }
 0x114   : > { %v564_v40 = vpop.f32.mrb[13].mxu0  ;;  %v725_v41 = vpop.f32.mrb[13].mxu1 }
 0x115   : > { %v1507_v42 = vpack.c.bf16 %v931_v36, %v931_v36  ;;  %v932_v43 = vmax.f32 %v907_v37, 0.0  ;;  %v826_v44 = vmax.f32 %v562_v38, %v564_v40  ;;  %v851_v45 = vmax.f32 %v723_v39, %v725_v41  ;;  %v566_v46 = vpop.f32.mrb[14].mxu0  ;;  %v727_v47 = vpop.f32.mrb[14].mxu1 }
 0x116   : > { %v568_v48 = vpop.f32.mrb[15].mxu0  ;;  %v729_v49 = vpop.f32.mrb[15].mxu1 }
 0x117   : > { %1058 = vst.msk [vmem:[%s1984_s12 + $0x10] sm:$0xf] %vm1053_vm2, %v1507_v42  ;;  %v1508_v50 = vpack.c.bf16 %v932_v43, %v932_v43  ;;  %v876_v51 = vmax.f32 %v826_v44, %v851_v45  ;;  %v827_v53 = vmax.f32 %v566_v46, %v568_v48  ;;  %v852_v54 = vmax.f32 %v727_v47, %v729_v49 }
 0x119   : > { %1059 = vst.msk [vmem:[%s1984_s12 + $0x14] sm:$0xf] %vm1053_vm2, %v1508_v50  ;;  %v908_v55 = vadd.f32 %v1980_v52, %v876_v51  ;;  %v877_v56 = vmax.f32 %v827_v53, %v852_v54 }
 0x11b   : > { %v933_v57 = vmax.f32 %v908_v55, 0.0  ;;  %v909_v58 = vadd.f32 %v1980_v52, %v877_v56  ;;  %v572_v59 = vpop.f32.mrb[16].mxu0  ;;  %v733_v60 = vpop.f32.mrb[16].mxu1 }
 0x11c   : > { %v574_v61 = vpop.f32.mrb[17].mxu0  ;;  %v735_v62 = vpop.f32.mrb[17].mxu1 }
 0x11d   : > { %v1509_v63 = vpack.c.bf16 %v933_v57, %v933_v57  ;;  %v934_v0 = vmax.f32 %v909_v58, 0.0  ;;  %v828_v1 = vmax.f32 %v572_v59, %v574_v61  ;;  %v853_v2 = vmax.f32 %v733_v60, %v735_v62  ;;  %v576_v3 = vpop.f32.mrb[18].mxu0  ;;  %v737_v4 = vpop.f32.mrb[18].mxu1 }
 0x11e   : > { %v578_v5 = vpop.f32.mrb[19].mxu0  ;;  %v739_v6 = vpop.f32.mrb[19].mxu1 }
 0x11f   : > { %1060 = vst.msk [vmem:[%s1984_s12 + $0x18] sm:$0xf] %vm1053_vm2, %v1509_v63  ;;  %v1510_v7 = vpack.c.bf16 %v934_v0, %v934_v0  ;;  %v878_v8 = vmax.f32 %v828_v1, %v853_v2  ;;  %v829_v9 = vmax.f32 %v576_v3, %v578_v5  ;;  %v854_v10 = vmax.f32 %v737_v4, %v739_v6 }
 0x121   : > { %1061 = vst.msk [vmem:[%s1984_s12 + $0x1c] sm:$0xf] %vm1053_vm2, %v1510_v7  ;;  %v910_v11 = vadd.f32 %v1980_v52, %v878_v8  ;;  %v879_v12 = vmax.f32 %v829_v9, %v854_v10 }
 0x123   : > { %v935_v13 = vmax.f32 %v910_v11, 0.0  ;;  %v911_v14 = vadd.f32 %v1980_v52, %v879_v12  ;;  %v582_v15 = vpop.f32.mrb[20].mxu0  ;;  %v743_v16 = vpop.f32.mrb[20].mxu1 }
 0x124   : > { %v584_v17 = vpop.f32.mrb[21].mxu0  ;;  %v745_v18 = vpop.f32.mrb[21].mxu1 }
 0x125   : > { %v1511_v19 = vpack.c.bf16 %v935_v13, %v935_v13  ;;  %v936_v20 = vmax.f32 %v911_v14, 0.0  ;;  %v830_v21 = vmax.f32 %v582_v15, %v584_v17  ;;  %v855_v22 = vmax.f32 %v743_v16, %v745_v18  ;;  %v586_v23 = vpop.f32.mrb[22].mxu0  ;;  %v747_v24 = vpop.f32.mrb[22].mxu1 }
 0x126   : > { %v588_v25 = vpop.f32.mrb[23].mxu0  ;;  %v749_v26 = vpop.f32.mrb[23].mxu1 }
 0x127   : > { %1062 = vst.msk [vmem:[%s1984_s12 + $0x20] sm:$0xf] %vm1053_vm2, %v1511_v19  ;;  %v1512_v27 = vpack.c.bf16 %v936_v20, %v936_v20  ;;  %v880_v28 = vmax.f32 %v830_v21, %v855_v22  ;;  %v831_v29 = vmax.f32 %v586_v23, %v588_v25  ;;  %v856_v30 = vmax.f32 %v747_v24, %v749_v26 }
 0x129   : > { %1063 = vst.msk [vmem:[%s1984_s12 + $0x24] sm:$0xf] %vm1053_vm2, %v1512_v27  ;;  %v912_v31 = vadd.f32 %v1980_v52, %v880_v28  ;;  %v881_v32 = vmax.f32 %v831_v29, %v856_v30 }
 0x12b   : > { %v937_v33 = vmax.f32 %v912_v31, 0.0  ;;  %v913_v34 = vadd.f32 %v1980_v52, %v881_v32  ;;  %v592_v35 = vpop.f32.mrb[24].mxu0  ;;  %v753_v36 = vpop.f32.mrb[24].mxu1 }
 0x12c   : > { %v594_v37 = vpop.f32.mrb[25].mxu0  ;;  %v755_v38 = vpop.f32.mrb[25].mxu1 }
 0x12d   : > { %v1513_v39 = vpack.c.bf16 %v937_v33, %v937_v33  ;;  %v938_v40 = vmax.f32 %v913_v34, 0.0  ;;  %v832_v41 = vmax.f32 %v592_v35, %v594_v37  ;;  %v857_v42 = vmax.f32 %v753_v36, %v755_v38  ;;  %v596_v43 = vpop.f32.mrb[26].mxu0  ;;  %v757_v44 = vpop.f32.mrb[26].mxu1 }
 0x12e   : > { %v598_v45 = vpop.f32.mrb[27].mxu0  ;;  %v759_v46 = vpop.f32.mrb[27].mxu1 }
 0x12f   : > { %1064 = vst.msk [vmem:[%s1984_s12 + $0x28] sm:$0xf] %vm1053_vm2, %v1513_v39  ;;  %v1514_v47 = vpack.c.bf16 %v938_v40, %v938_v40  ;;  %v882_v48 = vmax.f32 %v832_v41, %v857_v42  ;;  %v833_v49 = vmax.f32 %v596_v43, %v598_v45  ;;  %v858_v50 = vmax.f32 %v757_v44, %v759_v46 }
 0x131   : > { %1065 = vst.msk [vmem:[%s1984_s12 + $0x2c] sm:$0xf] %vm1053_vm2, %v1514_v47  ;;  %v914_v51 = vadd.f32 %v1980_v52, %v882_v48  ;;  %v883_v53 = vmax.f32 %v833_v49, %v858_v50 }
 0x133   : > { %v939_v54 = vmax.f32 %v914_v51, 0.0  ;;  %v915_v55 = vadd.f32 %v1980_v52, %v883_v53  ;;  %v602_v56 = vpop.f32.mrb[28].mxu0  ;;  %v763_v57 = vpop.f32.mrb[28].mxu1 }
 0x134   : > { %v604_v58 = vpop.f32.mrb[29].mxu0  ;;  %v765_v59 = vpop.f32.mrb[29].mxu1 }
 0x135   : > { %v1515_v60 = vpack.c.bf16 %v939_v54, %v939_v54  ;;  %v940_v61 = vmax.f32 %v915_v55, 0.0  ;;  %v834_v62 = vmax.f32 %v602_v56, %v604_v58  ;;  %v859_v63 = vmax.f32 %v763_v57, %v765_v59  ;;  %v606_v0 = vpop.f32.mrb[30].mxu0  ;;  %v767_v1 = vpop.f32.mrb[30].mxu1 }
 0x136   : > { %v608_v2 = vpop.f32.mrb[31].mxu0  ;;  %v769_v3 = vpop.f32.mrb[31].mxu1 }
 0x137   : > { %1066 = vst.msk [vmem:[%s1984_s12 + $0x30] sm:$0xf] %vm1053_vm2, %v1515_v60  ;;  %v1516_v4 = vpack.c.bf16 %v940_v61, %v940_v61  ;;  %v884_v5 = vmax.f32 %v834_v62, %v859_v63  ;;  %v835_v6 = vmax.f32 %v606_v0, %v608_v2  ;;  %v860_v7 = vmax.f32 %v767_v1, %v769_v3 }
 0x139   : > { %1067 = vst.msk [vmem:[%s1984_s12 + $0x34] sm:$0xf] %vm1053_vm2, %v1516_v4  ;;  %v916_v8 = vadd.f32 %v1980_v52, %v884_v5  ;;  %v885_v9 = vmax.f32 %v835_v6, %v860_v7 }
 0x13b   : > { %v941_v10 = vmax.f32 %v916_v8, 0.0  ;;  %v917_v11 = vadd.f32 %v1980_v52, %v885_v9  ;;  %v612_v12 = vpop.f32.mrb[32].mxu0  ;;  %v773_v13 = vpop.f32.mrb[32].mxu1 }
 0x13c   : > { %v614_v14 = vpop.f32.mrb[33].mxu0  ;;  %v775_v15 = vpop.f32.mrb[33].mxu1 }
 0x13d   : > { %v1517_v16 = vpack.c.bf16 %v941_v10, %v941_v10  ;;  %v942_v17 = vmax.f32 %v917_v11, 0.0  ;;  %v836_v18 = vmax.f32 %v612_v12, %v614_v14  ;;  %v861_v19 = vmax.f32 %v773_v13, %v775_v15  ;;  %v616_v20 = vpop.f32.mrb[34].mxu0  ;;  %v777_v21 = vpop.f32.mrb[34].mxu1 }
 0x13e   : > { %v618_v22 = vpop.f32.mrb[35].mxu0  ;;  %v779_v23 = vpop.f32.mrb[35].mxu1 }
 0x13f   : > { %1068 = vst.msk [vmem:[%s1984_s12 + $0x38] sm:$0xf] %vm1053_vm2, %v1517_v16  ;;  %v1518_v24 = vpack.c.bf16 %v942_v17, %v942_v17  ;;  %v886_v25 = vmax.f32 %v836_v18, %v861_v19  ;;  %v837_v26 = vmax.f32 %v616_v20, %v618_v22  ;;  %v862_v27 = vmax.f32 %v777_v21, %v779_v23 }
 0x141   : > { %1069 = vst.msk [vmem:[%s1984_s12 + $0x3c] sm:$0xf] %vm1053_vm2, %v1518_v24  ;;  %v918_v28 = vadd.f32 %v1980_v52, %v886_v25  ;;  %v887_v29 = vmax.f32 %v837_v26, %v862_v27 }
 0x143   : > { %v943_v30 = vmax.f32 %v918_v28, 0.0  ;;  %v919_v31 = vadd.f32 %v1980_v52, %v887_v29  ;;  %v622_v32 = vpop.f32.mrb[36].mxu0  ;;  %v783_v33 = vpop.f32.mrb[36].mxu1 }
 0x144   : > { %v624_v34 = vpop.f32.mrb[37].mxu0  ;;  %v785_v35 = vpop.f32.mrb[37].mxu1 }
 0x145   : > { %v1519_v36 = vpack.c.bf16 %v943_v30, %v943_v30  ;;  %v944_v37 = vmax.f32 %v919_v31, 0.0  ;;  %v838_v38 = vmax.f32 %v622_v32, %v624_v34  ;;  %v863_v39 = vmax.f32 %v783_v33, %v785_v35  ;;  %v626_v40 = vpop.f32.mrb[38].mxu0  ;;  %v787_v41 = vpop.f32.mrb[38].mxu1 }
 0x146   : > { %v628_v42 = vpop.f32.mrb[39].mxu0  ;;  %v789_v43 = vpop.f32.mrb[39].mxu1 }
 0x147   : > { %1070 = vst.msk [vmem:[%s1984_s12 + $0x40] sm:$0xf] %vm1053_vm2, %v1519_v36  ;;  %v1520_v44 = vpack.c.bf16 %v944_v37, %v944_v37  ;;  %v888_v45 = vmax.f32 %v838_v38, %v863_v39  ;;  %v839_v46 = vmax.f32 %v626_v40, %v628_v42  ;;  %v864_v47 = vmax.f32 %v787_v41, %v789_v43 }
 0x149   : > { %1071 = vst.msk [vmem:[%s1984_s12 + $0x44] sm:$0xf] %vm1053_vm2, %v1520_v44  ;;  %v920_v48 = vadd.f32 %v1980_v52, %v888_v45  ;;  %v889_v49 = vmax.f32 %v839_v46, %v864_v47 }
 0x14b   : > { %v945_v50 = vmax.f32 %v920_v48, 0.0  ;;  %v921_v51 = vadd.f32 %v1980_v52, %v889_v49  ;;  %v632_v53 = vpop.f32.mrb[40].mxu0  ;;  %v793_v54 = vpop.f32.mrb[40].mxu1 }
 0x14c   : > { %v634_v55 = vpop.f32.mrb[41].mxu0  ;;  %v795_v56 = vpop.f32.mrb[41].mxu1 }
 0x14d   : > { %v1521_v57 = vpack.c.bf16 %v945_v50, %v945_v50  ;;  %v946_v58 = vmax.f32 %v921_v51, 0.0  ;;  %v840_v59 = vmax.f32 %v632_v53, %v634_v55  ;;  %v865_v60 = vmax.f32 %v793_v54, %v795_v56  ;;  %v636_v61 = vpop.f32.mrb[42].mxu0  ;;  %v797_v62 = vpop.f32.mrb[42].mxu1 }
 0x14e   : > { %v638_v63 = vpop.f32.mrb[43].mxu0  ;;  %v799_v0 = vpop.f32.mrb[43].mxu1 }
 0x14f   : > { %1072 = vst.msk [vmem:[%s1984_s12 + $0x48] sm:$0xf] %vm1053_vm2, %v1521_v57  ;;  %v1522_v1 = vpack.c.bf16 %v946_v58, %v946_v58  ;;  %v890_v2 = vmax.f32 %v840_v59, %v865_v60  ;;  %v841_v3 = vmax.f32 %v636_v61, %v638_v63  ;;  %v866_v4 = vmax.f32 %v797_v62, %v799_v0 }
 0x151   : > { %1073 = vst.msk [vmem:[%s1984_s12 + $0x4c] sm:$0xf] %vm1053_vm2, %v1522_v1  ;;  %v922_v5 = vadd.f32 %v1980_v52, %v890_v2  ;;  %v891_v6 = vmax.f32 %v841_v3, %v866_v4 }
 0x153   : > { %v947_v7 = vmax.f32 %v922_v5, 0.0  ;;  %v923_v8 = vadd.f32 %v1980_v52, %v891_v6  ;;  %v642_v9 = vpop.f32.mrb[44].mxu0  ;;  %v803_v10 = vpop.f32.mrb[44].mxu1 }
 0x154   : > { %v644_v11 = vpop.f32.mrb[45].mxu0  ;;  %v805_v12 = vpop.f32.mrb[45].mxu1 }
 0x155   : > { %v1523_v13 = vpack.c.bf16 %v947_v7, %v947_v7  ;;  %v948_v14 = vmax.f32 %v923_v8, 0.0  ;;  %v842_v15 = vmax.f32 %v642_v9, %v644_v11  ;;  %v867_v16 = vmax.f32 %v803_v10, %v805_v12  ;;  %v646_v17 = vpop.f32.mrb[46].mxu0  ;;  %v807_v18 = vpop.f32.mrb[46].mxu1 }
 0x156   : > { %v648_v19 = vpop.f32.mrb[47].mxu0  ;;  %v809_v20 = vpop.f32.mrb[47].mxu1 }
 0x157   : > { %1074 = vst.msk [vmem:[%s1984_s12 + $0x50] sm:$0xf] %vm1053_vm2, %v1523_v13  ;;  %v1524_v21 = vpack.c.bf16 %v948_v14, %v948_v14  ;;  %v892_v22 = vmax.f32 %v842_v15, %v867_v16  ;;  %v843_v23 = vmax.f32 %v646_v17, %v648_v19  ;;  %v868_v24 = vmax.f32 %v807_v18, %v809_v20 }
 0x159   : > { %1075 = vst.msk [vmem:[%s1984_s12 + $0x54] sm:$0xf] %vm1053_vm2, %v1524_v21  ;;  %v924_v25 = vadd.f32 %v1980_v52, %v892_v22  ;;  %v893_v26 = vmax.f32 %v843_v23, %v868_v24 }
 0x15b   : > { %v949_v27 = vmax.f32 %v924_v25, 0.0  ;;  %v925_v28 = vadd.f32 %v1980_v52, %v893_v26  ;;  %v652_v29 = vpop.f32.mrb[48].mxu0  ;;  %v813_v30 = vpop.f32.mrb[48].mxu1 }
 0x15c   : > { %v654_v31 = vpop.f32.mrb[49].mxu0  ;;  %v815_v32 = vpop.f32.mrb[49].mxu1 }
 0x15d   : > { %v1525_v33 = vpack.c.bf16 %v949_v27, %v949_v27  ;;  %v950_v34 = vmax.f32 %v925_v28, 0.0  ;;  %v844_v35 = vmax.f32 %v652_v29, %v654_v31  ;;  %v869_v36 = vmax.f32 %v813_v30, %v815_v32  ;;  %v656_v37 = vpop.f32.mrb[50].mxu0  ;;  %v817_v38 = vpop.f32.mrb[50].mxu1 }
 0x15e   : > { %v657_v39 = vpop.f32.mrb[51].mxu0  ;;  %v818_v40 = vpop.f32.mrb[51].mxu1 }
 0x15f   : > { %1076 = vst.msk [vmem:[%s1984_s12 + $0x58] sm:$0xf] %vm1053_vm2, %v1525_v33  ;;  %v1526_v41 = vpack.c.bf16 %v950_v34, %v950_v34  ;;  %v894_v42 = vmax.f32 %v844_v35, %v869_v36 }
 0x161   : > { %1077 = vst.msk [vmem:[%s1984_s12 + $0x5c] sm:$0xf] %vm1053_vm2, %v1526_v41  ;;  %v926_v43 = vadd.f32 %v1980_v52, %v894_v42  ;;  %1085 = sbr.rel (!%p1813_p4) target bundleno = 438 (0x1b6), region = 36 }
 0x163   : > { %v951_v44 = vmax.f32 %v926_v43, 0.0 }
 0x165   : > { %v1527_v45 = vpack.c.bf16 %v951_v44, %v951_v44 }
 0x167   : > { %1078 = vst.msk [vmem:[%s1984_s12 + $0x60] sm:$0xf] %vm1053_vm2, %v1527_v45 }
 0x168   : > { %s2187_s26 = smov (!%p1088_p8, %s1087_s26), 25 }
 0x169   : > { %s1491_s6 = sshll.u32 %s2187_s26, 6 }
 0x16a   : > { %p1494_p9 = scmp.eq.s32.totalorder %s1491_s6, 0 }
 0x16b   : > { %1675 = sdivrem.u32 (!%p1494_p9), %s2187_s26, 25 }
 0x16c   : > { %1096 = sbr.rel (%p1494_p9) target bundleno = 438 (0x1b6), region = 40 }
 0x174   : > { %s2072_s20 = spop.drf %1675 }
 0x175   : > { %p1495_p10 = scmp.le.s32.totalorder %s2072_s20, 0 }
 0x176   : > { %s2180_s15 = smov (!%p1495_p10), %s2066_s4  ;;  %s2181_s29 = smov (!%p1495_p10), %s1984_s12 }
 0x177   : > { %1347 = sbr.rel (%p1495_p10) target bundleno = 409 (0x199), region = 112  ;;  %s2081_s5 = smov (!%p1495_p10), 0  }
 0x178   : > { %s2083_s7 = smov (!%p1495_p10), 0  }
 0x17e LB: >> { %v1113_v52 = vld [vmem:[%s1741_s29] sm:$0xf]  ;;  %v1115_v46 = vld [vmem:[%s1741_s29 + $0x4] sm:$0xf]  ;;  %v1117_v47 = vld [vmem:[%s1741_s29 + $0x8] sm:$0xf]  ;;  %s1749_s7 = sphi %s2083_s7, %s1107_s7   ;;  %s1745_s5 = sphi %s2081_s5, %s2182_s5   ;;  %s1741_s29 = sphi %s2181_s29, %s1168_s29   ;;  %s1737_s15 = sphi %s2180_s15, %s1169_s15  }
 0x17f   : >> { %1114 = vst [vmem:[%s1737_s15] sm:$0xf] %v1113_v52  ;;  %1116 = vst [vmem:[%s1737_s15 + $0x4] sm:$0xf] %v1115_v46  ;;  %v1119_v48 = vld [vmem:[%s1741_s29 + $0xc] sm:$0xf]  ;;  %s1163_s8 = sadd.s32 1, %s1745_s5 }
 0x180   : >> { %1118 = vst [vmem:[%s1737_s15 + $0x8] sm:$0xf] %v1117_v47  ;;  %v1121_v49 = vld [vmem:[%s1741_s29 + $0x10] sm:$0xf]  ;;  %v1123_v50 = vld [vmem:[%s1741_s29 + $0x14] sm:$0xf]  ;;  %p1164_p11 = scmp.ge.s32.totalorder %s1163_s8, %s2072_s20 }
 0x181   : >> { %1120 = vst [vmem:[%s1737_s15 + $0xc] sm:$0xf] %v1119_v48  ;;  %1122 = vst [vmem:[%s1737_s15 + $0x10] sm:$0xf] %v1121_v49  ;;  %v1125_v51 = vld [vmem:[%s1741_s29 + $0x18] sm:$0xf] }
 0x182   : >> { %1124 = vst [vmem:[%s1737_s15 + $0x14] sm:$0xf] %v1123_v50  ;;  %v1127_v53 = vld [vmem:[%s1741_s29 + $0x1c] sm:$0xf]  ;;  %v1129_v54 = vld [vmem:[%s1741_s29 + $0x20] sm:$0xf] }
 0x183   : >> { %1126 = vst [vmem:[%s1737_s15 + $0x18] sm:$0xf] %v1125_v51  ;;  %1128 = vst [vmem:[%s1737_s15 + $0x1c] sm:$0xf] %v1127_v53  ;;  %v1131_v55 = vld [vmem:[%s1741_s29 + $0x24] sm:$0xf] }
 0x184   : >> { %1130 = vst [vmem:[%s1737_s15 + $0x20] sm:$0xf] %v1129_v54  ;;  %v1133_v56 = vld [vmem:[%s1741_s29 + $0x28] sm:$0xf]  ;;  %v1135_v57 = vld [vmem:[%s1741_s29 + $0x2c] sm:$0xf] }
 0x185   : >> { %1132 = vst [vmem:[%s1737_s15 + $0x24] sm:$0xf] %v1131_v55  ;;  %1134 = vst [vmem:[%s1737_s15 + $0x28] sm:$0xf] %v1133_v56  ;;  %v1137_v58 = vld [vmem:[%s1741_s29 + $0x30] sm:$0xf] }
 0x186   : >> { %1136 = vst [vmem:[%s1737_s15 + $0x2c] sm:$0xf] %v1135_v57  ;;  %v1139_v59 = vld [vmem:[%s1741_s29 + $0x34] sm:$0xf]  ;;  %v1141_v60 = vld [vmem:[%s1741_s29 + $0x38] sm:$0xf] }
 0x187   : >> { %1138 = vst [vmem:[%s1737_s15 + $0x30] sm:$0xf] %v1137_v58  ;;  %1140 = vst [vmem:[%s1737_s15 + $0x34] sm:$0xf] %v1139_v59  ;;  %v1143_v61 = vld [vmem:[%s1741_s29 + $0x3c] sm:$0xf] }
 0x188   : >> { %1142 = vst [vmem:[%s1737_s15 + $0x38] sm:$0xf] %v1141_v60  ;;  %v1145_v62 = vld [vmem:[%s1741_s29 + $0x40] sm:$0xf]  ;;  %v1147_v63 = vld [vmem:[%s1741_s29 + $0x44] sm:$0xf] }
 0x189   : >> { %1144 = vst [vmem:[%s1737_s15 + $0x3c] sm:$0xf] %v1143_v61  ;;  %1146 = vst [vmem:[%s1737_s15 + $0x40] sm:$0xf] %v1145_v62  ;;  %v1149_v0 = vld [vmem:[%s1741_s29 + $0x48] sm:$0xf] }
 0x18a   : >> { %1148 = vst [vmem:[%s1737_s15 + $0x44] sm:$0xf] %v1147_v63  ;;  %v1151_v1 = vld [vmem:[%s1741_s29 + $0x4c] sm:$0xf]  ;;  %v1153_v2 = vld [vmem:[%s1741_s29 + $0x50] sm:$0xf] }
 0x18b   : >> { %1150 = vst [vmem:[%s1737_s15 + $0x48] sm:$0xf] %v1149_v0  ;;  %1152 = vst [vmem:[%s1737_s15 + $0x4c] sm:$0xf] %v1151_v1  ;;  %v1155_v3 = vld [vmem:[%s1741_s29 + $0x54] sm:$0xf] }
 0x18c   : >> { %1154 = vst [vmem:[%s1737_s15 + $0x50] sm:$0xf] %v1153_v2  ;;  %v1157_v4 = vld [vmem:[%s1741_s29 + $0x58] sm:$0xf]  ;;  %v1159_v5 = vld [vmem:[%s1741_s29 + $0x5c] sm:$0xf] }
 0x18d   : >> { %1156 = vst [vmem:[%s1737_s15 + $0x54] sm:$0xf] %v1155_v3  ;;  %1158 = vst [vmem:[%s1737_s15 + $0x58] sm:$0xf] %v1157_v4  ;;  %v1161_v6 = vld [vmem:[%s1741_s29 + $0x60] sm:$0xf] }
 0x18e   : >> { %1160 = vst [vmem:[%s1737_s15 + $0x5c] sm:$0xf] %v1159_v5  ;;  %1162 = vst [vmem:[%s1737_s15 + $0x60] sm:$0xf] %v1161_v6  ;;  %s2189_s8 = smov (%p1164_p11, %s1163_s8), 0  ;;  %s1107_s7 = sadd.s32 1, %s1749_s7  }
 0x18f   : >> { %s1166_s9 = smul.u32 100, %s2189_s8  ;;  %p1106_p12 = scmp.ge.s32.totalorder %s1107_s7, %s2072_s20 }
 0x190   : >> { %s2182_s5 = smov %s2189_s8 }
 0x191   : >> { %s1168_s29 = scalar_lea.vmem %s1984_s12, %s1166_s9 [#allocation2]   ;;  %s1169_s15 = scalar_lea.vmem %s2066_s4, %s1166_s9  }
 0x192   : > { %1109 = sbr.rel (!%p1106_p12) target bundleno = 382 (0x17e), region = 118 }
 0x199 PF: > { %1677 = sdivrem.u32 %s2187_s26, 25 }
 0x19a   : > { %s1496_s10 = smul.u32 100, %s2072_s20 }
 0x19c   : > { %s1174_s11 = scalar_lea.vmem %s1984_s12, %s1496_s10 [#allocation2]   ;;  %s1176_s14 = scalar_lea.vmem %s2066_s4, %s1496_s10  }
 0x1a2   : > { %s1678_s17 = spop.drf %1677 }
 0x1a3   : > { %p1498_p13 = scmp.le.s32.totalorder %s1678_s17, 0 }
 0x1a4   : > { %s1751_s18 = smov (!%p1498_p13), %s1176_s14   ;;  %s1755_s21 = smov (!%p1498_p13), %s1174_s11  }
 0x1a5   : > { %1361 = sbr.rel (%p1498_p13) target bundleno = 438 (0x1b6), region = 123  ;;  %s1759_s22 = smov (!%p1498_p13), 0  }
 0x1a6   : > { %s1763_s23 = smov (!%p1498_p13), 0  }
 0x1ac LB: >> { %v1186_v7 = vld [vmem:[%s1757_s21] sm:$0xf]  ;;  %s1188_s24 = sadd.s32 1, %s1761_s22  ;;  %s1180_s23 = sadd.s32 1, %s1765_s23   ;;  %s1765_s23 = sphi %s1763_s23, %s1180_s23   ;;  %s1761_s22 = sphi %s1759_s22, %s1760_s22   ;;  %s1757_s21 = sphi %s1755_s21, %s1193_s21   ;;  %s1753_s18 = sphi %s1751_s18, %s1194_s18  }
 0x1ad   : >> { %1187 = vst [vmem:[%s1753_s18] sm:$0xf] %v1186_v7  ;;  %p1189_p0 = scmp.ge.s32.totalorder %s1188_s24, %s1678_s17  ;;  %p1179_p1 = scmp.ge.s32.totalorder %s1180_s23, %s1678_s17 }
 0x1af   : >> { %s2191_s24 = smov (%p1189_p0, %s1188_s24), 0  ;;  %1182 = sbr.rel (!%p1179_p1) target bundleno = 428 (0x1ac), region = 129 }
 0x1b0   : >> { %s1499_s25 = sshll.u32 %s2191_s24, 2  ;;  %s1760_s22 = smov %s2191_s24  }
 0x1b1   : >> { %s1193_s21 = scalar_lea.vmem %s1174_s11, %s1499_s25 [#allocation2]   ;;  %s1194_s18 = scalar_lea.vmem %s1176_s14, %s1499_s25  }
 0x1b6 PF: > { %p10_p2 = scmp.ge.s32.totalorder %s1803_s16, 4   ;;  %s2183_s12 = smov %s1729_s13 }
 0x1b7   : > { %s2184_s13 = smov %s1811_s19  ;;  %s2185_s14 = smov %s1803_s16 }
 0x1b8   :  { %12 = sbr.rel (!%p10_p2) target bundleno = 2 (0x2), region = 140 }

// kernel: lenet_forward.4
= control target key start
LH: loop header
LB: loop body
LE: loop exit
PB: predicated region body
PF: predicated region fallthrough
CT: control target
= control target key end

     0   :  { %vm379_vm0 = vcmask 719872   ;;  %vm392_vm1 = vcmask 1043456   ;;  %vm618_vm2 = vcmask 125952   ;;  %vm625_vm3 = vcmask 122880   ;;  %s1063_s1 = inlined_call_operand.vmem [shape: bf16[216,512], index: 1, kind: input, shape index: {}]   ;;  %s1064_s0 = inlined_call_operand.vmem [shape: bf16[50,216], index: 0, kind: input, shape index: {}]   ;;  %s1065_s2 = inlined_call_operand.vmem [shape: f32[1,128], index: 2, kind: input, shape index: {}]   ;;  %s1066_s3 = inlined_call_operand.vmem [shape: bf16[50,16], index: 3, kind: output, shape index: {}]  }
   0x1   :  { %v720_v0 = vld [vmem:[%s1063_s1 + $0x4] ss:$16 sps:$4 sm:$0xff]   ;;  %v722_v1 = vld [vmem:[%s1063_s1 + $0xc] ss:$16 sps:$4 sm:$0xff]   ;;  %v724_v2 = vld [vmem:[%s1063_s1] ss:$16 sps:$4 sm:$0xff]  }
   0x2   :  { %405 = vmatprep.subr.bf16.mxu0 %v720_v0  ;;  %v725_v3 = vld [vmem:[%s1063_s1 + $0x8] ss:$16 sps:$4 sm:$0xff]   ;;  %476 = vmatprep.subr.bf16.mxu1 %v722_v1  ;;  %v726_v4 = vld [vmem:[%s1063_s1 + $0x24] ss:$16 sps:$4 sm:$0xff]   ;;  %v728_v5 = vld [vmem:[%s1063_s1 + $0x2c] ss:$16 sps:$4 sm:$0xff]  }
   0x3   :  { %406 = vmatpush1.bf16.msra.mxu0 %v724_v2  ;;  %477 = vmatpush1.bf16.msra.mxu1 %v725_v3  ;;  %v730_v6 = vld [vmem:[%s1063_s1 + $0x20] ss:$16 sps:$4 sm:$0xff]   ;;  %v731_v7 = vld [vmem:[%s1063_s1 + $0x28] ss:$16 sps:$4 sm:$0xff]   ;;  %v732_v8 = vld [vmem:[%s1063_s1 + $0x44] ss:$16 sps:$4 sm:$0xff]  }
   0x4   :  { %407 = vmatprep.subr.bf16.mxu0 %v726_v4  ;;  %478 = vmatprep.subr.bf16.mxu1 %v728_v5  ;;  %v734_v9 = vld [vmem:[%s1063_s1 + $0x4c] ss:$16 sps:$4 sm:$0xff]   ;;  %v736_v10 = vld [vmem:[%s1063_s1 + $0x40] ss:$16 sps:$4 sm:$0xff]   ;;  %v737_v11 = vld [vmem:[%s1063_s1 + $0x48] ss:$16 sps:$4 sm:$0xff]  }
   0x5   :  { %v738_v12 = vld [vmem:[%s1063_s1 + $0x64] ss:$16 sps:$4 sm:$0xff]   ;;  %v740_v13 = vld [vmem:[%s1063_s1 + $0x6c] ss:$16 sps:$4 sm:$0xff]   ;;  %v742_v14 = vld [vmem:[%s1063_s1 + $0x60] ss:$16 sps:$4 sm:$0xff]  }
   0x6   :  { %v743_v15 = vld [vmem:[%s1063_s1 + $0x68] ss:$16 sps:$4 sm:$0xff]   ;;  %v744_v16 = vld [vmem:[%s1063_s1 + $0x84] ss:$16 sps:$4 sm:$0xff]   ;;  %v746_v17 = vld [vmem:[%s1063_s1 + $0x8c] ss:$16 sps:$4 sm:$0xff]  }
   0x7   :  { %408 = vmatpush1.bf16.msra.mxu0 %v730_v6  ;;  %479 = vmatpush1.bf16.msra.mxu1 %v731_v7  ;;  %v748_v18 = vld [vmem:[%s1063_s1 + $0x80] ss:$16 sps:$4 sm:$0xff]   ;;  %v749_v19 = vld [vmem:[%s1063_s1 + $0x88] ss:$16 sps:$4 sm:$0xff]   ;;  %v750_v20 = vld [vmem:[%s1063_s1 + $0xa4] ss:$16 sps:$4 sm:$0xff]  }
   0x8   :  { %409 = vmatprep.subr.bf16.mxu0 %v732_v8  ;;  %480 = vmatprep.subr.bf16.mxu1 %v734_v9  ;;  %v752_v21 = vld [vmem:[%s1063_s1 + $0xac] ss:$16 sps:$4 sm:$0xff]   ;;  %v754_v22 = vld [vmem:[%s1063_s1 + $0xa0] ss:$16 sps:$4 sm:$0xff]   ;;  %v755_v23 = vld [vmem:[%s1063_s1 + $0xa8] ss:$16 sps:$4 sm:$0xff]  }
   0x9   :  { %v756_v24 = vld [vmem:[%s1063_s1 + $0xc4] ss:$16 sps:$4 sm:$0xff]   ;;  %v758_v25 = vld [vmem:[%s1063_s1 + $0xcc] ss:$16 sps:$4 sm:$0xff]   ;;  %v760_v26 = vld [vmem:[%s1063_s1 + $0xc0] ss:$16 sps:$4 sm:$0xff]  }
   0xa   :  { %v761_v27 = vld [vmem:[%s1063_s1 + $0xc8] ss:$16 sps:$4 sm:$0xff]   ;;  %v762_v28 = vld [vmem:[%s1063_s1 + $0xe4] ss:$16 sps:$4 sm:$0xff]   ;;  %v764_v29 = vld [vmem:[%s1063_s1 + $0xec] ss:$16 sps:$4 sm:$0xff]  }
   0xb   :  { %410 = vmatpush1.bf16.msra.mxu0 %v736_v10  ;;  %481 = vmatpush1.bf16.msra.mxu1 %v737_v11  ;;  %v766_v30 = vld [vmem:[%s1063_s1 + $0xe0] ss:$16 sps:$4 sm:$0xff]   ;;  %v767_v31 = vld [vmem:[%s1063_s1 + $0xe8] ss:$16 sps:$4 sm:$0xff]   ;;  %v768_v32 = vld [vmem:[%s1063_s1 + $0x104] ss:$16 sps:$4 sm:$0xff]  }
   0xc   :  { %411 = vmatprep.subr.bf16.mxu0 %v738_v12  ;;  %482 = vmatprep.subr.bf16.mxu1 %v740_v13  ;;  %v770_v33 = vld [vmem:[%s1063_s1 + $0x10c] ss:$16 sps:$4 sm:$0xff]   ;;  %v772_v34 = vld [vmem:[%s1063_s1 + $0x100] ss:$16 sps:$4 sm:$0xff]   ;;  %v773_v35 = vld [vmem:[%s1063_s1 + $0x108] ss:$16 sps:$4 sm:$0xff]  }
   0xd   :  { %v774_v36 = vld [vmem:[%s1063_s1 + $0x124] ss:$16 sps:$4 sm:$0xff]   ;;  %v776_v37 = vld [vmem:[%s1063_s1 + $0x12c] ss:$16 sps:$4 sm:$0xff]   ;;  %v778_v38 = vld [vmem:[%s1063_s1 + $0x120] ss:$16 sps:$4 sm:$0xff]  }
   0xe   :  { %v779_v39 = vld [vmem:[%s1063_s1 + $0x128] ss:$16 sps:$4 sm:$0xff]   ;;  %v804_v40 = vld [vmem:[%s1064_s0 + $0x4] ss:$8 sps:$4 sm:$0xff]   ;;  %v784_v43 = vld [vmem:[%s1063_s1 + $0x140] ss:$16 sps:$4 sm:$0xff]  }
   0xf   :  { %412 = vmatpush1.bf16.msra.mxu0 %v742_v14  ;;  %483 = vmatpush1.bf16.msra.mxu1 %v743_v15  ;;  %v780_v41 = vld [vmem:[%s1063_s1 + $0x144] ss:$16 sps:$4 sm:$0xff]   ;;  %v782_v42 = vld [vmem:[%s1063_s1 + $0x14c] ss:$16 sps:$4 sm:$0xff]   ;;  %v785_v44 = vld [vmem:[%s1063_s1 + $0x148] ss:$16 sps:$4 sm:$0xff]  }
  0x10   :  { %413 = vmatprep.subr.bf16.mxu0 %v744_v16  ;;  %484 = vmatprep.subr.bf16.mxu1 %v746_v17  ;;  %v786_v45 = vld [vmem:[%s1063_s1 + $0x164] ss:$16 sps:$4 sm:$0xff]   ;;  %v788_v46 = vld [vmem:[%s1063_s1 + $0x16c] ss:$16 sps:$4 sm:$0xff]   ;;  %v790_v47 = vld [vmem:[%s1063_s1 + $0x160] ss:$16 sps:$4 sm:$0xff]  }
  0x11   :  { %696 = vmatprep.mubr.msk.bf16.mxu0 %vm379_vm0, %v804_v40  ;;  %701 = vmatprep.mubr.msk.bf16.mxu1 %vm379_vm0, %v804_v40  ;;  %v791_v48 = vld [vmem:[%s1063_s1 + $0x168] ss:$16 sps:$4 sm:$0xff]   ;;  %v792_v49 = vld [vmem:[%s1063_s1 + $0x184] ss:$16 sps:$4 sm:$0xff]   ;;  %v794_v50 = vld [vmem:[%s1063_s1 + $0x18c] ss:$16 sps:$4 sm:$0xff]  }
  0x12   :  { %v74_v51 = vld [vmem:[%s1063_s1 + $0x1a0] sm:$0xff]  ;;  %v75_v52 = vld [vmem:[%s1063_s1 + $0x1a8] sm:$0xff]  ;;  %v805_v62 = vld [vmem:[%s1064_s0 + $0x14] ss:$8 sps:$4 sm:$0xff]  }
  0x13   :  { %414 = vmatpush1.bf16.msra.mxu0 %v748_v18  ;;  %485 = vmatpush1.bf16.msra.mxu1 %v749_v19  ;;  %v796_v53 = vld [vmem:[%s1063_s1 + $0x180] ss:$16 sps:$4 sm:$0xff]   ;;  %v797_v54 = vld [vmem:[%s1063_s1 + $0x188] ss:$16 sps:$4 sm:$0xff]   ;;  %v692_v55 = vcombine.high %v74_v51, %v74_v51  ;;  %v694_v56 = vcombine.high %v75_v52, %v75_v52  ;;  %v691_v57 = vcombine.low %v74_v51, %v74_v51  ;;  %v808_v0 = vld [vmem:[%s1064_s0 + $0x24] ss:$8 sps:$4 sm:$0xff]  }
  0x14   :  { %415 = vmatprep.subr.bf16.mxu0 %v750_v20  ;;  %486 = vmatprep.subr.bf16.mxu1 %v752_v21  ;;  %v693_v58 = vcombine.low %v75_v52, %v75_v52  ;;  %v802_v61 = vld [vmem:[%s1064_s0] ss:$8 sps:$4 sm:$0xff]   ;;  %v807_v63 = vld [vmem:[%s1064_s0 + $0x10] ss:$8 sps:$4 sm:$0xff]  }
  0x15   :  { %v394_v59 = vsel %vm392_vm1, %v691_v57, 0  ;;  %v21_v1 = vld [vmem:[%s1064_s0 + $0x30] sm:$0x11]  ;;  %v810_v2 = vld [vmem:[%s1064_s0 + $0x20] ss:$8 sps:$4 sm:$0xff]  }
  0x16   :  { %v400_v60 = vsel %vm392_vm1, %v693_v58, 0  ;;  %v638_v3 = vcombine.high %v21_v1, %v21_v1  ;;  %v637_v4 = vcombine.low %v21_v1, %v21_v1  ;;  %v1027_v13 = vld [vmem:[%s1065_s2] ss:$0 sm:$0xff] }
  0x17   :  { %416 = vmatpush1.bf16.msra.mxu0 %v754_v22  ;;  %487 = vmatpush1.bf16.msra.mxu1 %v755_v23 }
  0x18   :  { %417 = vmatprep.subr.bf16.mxu0 %v756_v24  ;;  %488 = vmatprep.subr.bf16.mxu1 %v758_v25 }
  0x1b   :  { %418 = vmatpush1.bf16.msra.mxu0 %v760_v26  ;;  %489 = vmatpush1.bf16.msra.mxu1 %v761_v27 }
  0x1c   :  { %419 = vmatprep.subr.bf16.mxu0 %v762_v28  ;;  %490 = vmatprep.subr.bf16.mxu1 %v764_v29 }
  0x1f   :  { %420 = vmatpush1.bf16.msra.mxu0 %v766_v30  ;;  %491 = vmatpush1.bf16.msra.mxu1 %v767_v31 }
  0x20   :  { %421 = vmatprep.subr.bf16.mxu0 %v768_v32  ;;  %492 = vmatprep.subr.bf16.mxu1 %v770_v33 }
  0x23   :  { %422 = vmatpush1.bf16.msra.mxu0 %v772_v34  ;;  %493 = vmatpush1.bf16.msra.mxu1 %v773_v35 }
  0x24   :  { %423 = vmatprep.subr.bf16.mxu0 %v774_v36  ;;  %494 = vmatprep.subr.bf16.mxu1 %v776_v37 }
  0x27   :  { %424 = vmatpush1.bf16.msra.mxu0 %v778_v38  ;;  %495 = vmatpush1.bf16.msra.mxu1 %v779_v39 }
  0x28   :  { %425 = vmatprep.subr.bf16.mxu0 %v780_v41  ;;  %496 = vmatprep.subr.bf16.mxu1 %v782_v42 }
  0x2b   :  { %426 = vmatpush1.bf16.msra.mxu0 %v784_v43  ;;  %497 = vmatpush1.bf16.msra.mxu1 %v785_v44 }
  0x2c   :  { %427 = vmatprep.subr.bf16.mxu0 %v786_v45  ;;  %498 = vmatprep.subr.bf16.mxu1 %v788_v46 }
  0x2f   :  { %428 = vmatpush1.bf16.msra.mxu0 %v790_v47  ;;  %499 = vmatpush1.bf16.msra.mxu1 %v791_v48 }
  0x30   :  { %429 = vmatprep.subr.bf16.mxu0 %v792_v49  ;;  %500 = vmatprep.subr.bf16.mxu1 %v794_v50 }
  0x33   :  { %430 = vmatpush1.bf16.msra.mxu0 %v796_v53  ;;  %501 = vmatpush1.bf16.msra.mxu1 %v797_v54 }
  0x34   :  { %695 = vmatprep.subr.msk.bf16.mxu0 %vm392_vm1, %v692_v55  ;;  %700 = vmatprep.subr.msk.bf16.mxu1 %vm392_vm1, %v694_v56 }
  0x37   :  { %432 = vmatpush1.bf16.msra.mxu0 %v394_v59  ;;  %503 = vmatpush1.bf16.msra.mxu1 %v400_v60 }
  0x3a   :  { %438 = vmatmul.mubr.bf16.vlgmr.msra.gmra.mrb[0].mxu0 %v802_v61  ;;  %509 = vmatmul.mubr.bf16.vlgmr.msra.gmra.mrb[0].mxu1 %v802_v61 }
  0x3b   :  { %697 = vmatprep.mubr.msk.bf16.mxu0 %vm379_vm0, %v805_v62  ;;  %702 = vmatprep.mubr.msk.bf16.mxu1 %vm379_vm0, %v805_v62 }
  0x42   :  { %448 = vmatmul.mubr.bf16.gmra.mrb[4].mxu0 %v807_v63  ;;  %519 = vmatmul.mubr.bf16.gmra.mrb[4].mxu1 %v807_v63 }
  0x43   :  { %698 = vmatprep.mubr.msk.bf16.mxu0 %vm379_vm0, %v808_v0  ;;  %703 = vmatprep.mubr.msk.bf16.mxu1 %vm379_vm0, %v808_v0 }
  0x4a   :  { %458 = vmatmul.mubr.bf16.gmra.mrb[8].mxu0 %v810_v2  ;;  %529 = vmatmul.mubr.bf16.gmra.mrb[8].mxu1 %v810_v2 }
  0x4b   :  { %699 = vmatprep.mubr.msk.bf16.mxu0 %vm379_vm0, %v638_v3  ;;  %704 = vmatprep.mubr.msk.bf16.mxu1 %vm379_vm0, %v638_v3 }
  0x52   :  { %468 = vmatmul.mubr.bf16.gmra.mrb[12].mxu0 %v637_v4  ;;  %539 = vmatmul.mubr.bf16.gmra.mrb[12].mxu1 %v637_v4 }
 0x10d   :  { %v439_v5 = vpop.f32.mrb[0].mxu0  ;;  %v510_v6 = vpop.f32.mrb[0].mxu1 }
 0x10e   :  { %v441_v7 = vpop.f32.mrb[1].mxu0  ;;  %v512_v8 = vpop.f32.mrb[1].mxu1 }
 0x10f   :  { %v547_v9 = vmax.f32 %v439_v5, %v441_v7  ;;  %v554_v10 = vmax.f32 %v510_v6, %v512_v8  ;;  %v443_v11 = vpop.f32.mrb[2].mxu0  ;;  %v514_v12 = vpop.f32.mrb[2].mxu1 }
 0x110   :  { %v445_v14 = vpop.f32.mrb[3].mxu0  ;;  %v516_v15 = vpop.f32.mrb[3].mxu1 }
 0x111   :  { %v561_v16 = vmax.f32 %v547_v9, %v554_v10  ;;  %v548_v17 = vmax.f32 %v443_v11, %v445_v14  ;;  %v555_v18 = vmax.f32 %v514_v12, %v516_v15 }
 0x113   :  { %v575_v19 = vadd.f32 %v1027_v13, %v561_v16  ;;  %v562_v20 = vmax.f32 %v548_v17, %v555_v18 }
 0x115   :  { %v582_v21 = vmax.f32 %v575_v19, 0.0  ;;  %v576_v22 = vadd.f32 %v1027_v13, %v562_v20  ;;  %v449_v23 = vpop.f32.mrb[4].mxu0  ;;  %v520_v24 = vpop.f32.mrb[4].mxu1 }
 0x116   :  { %v451_v25 = vpop.f32.mrb[5].mxu0  ;;  %v522_v26 = vpop.f32.mrb[5].mxu1 }
 0x117   :  { %v713_v27 = vpack.c.bf16 %v582_v21, %v582_v21  ;;  %v583_v28 = vmax.f32 %v576_v22, 0.0  ;;  %v549_v29 = vmax.f32 %v449_v23, %v451_v25  ;;  %v556_v30 = vmax.f32 %v520_v24, %v522_v26  ;;  %v453_v31 = vpop.f32.mrb[6].mxu0  ;;  %v524_v32 = vpop.f32.mrb[6].mxu1 }
 0x118   :  { %v455_v33 = vpop.f32.mrb[7].mxu0  ;;  %v526_v34 = vpop.f32.mrb[7].mxu1 }
 0x119   :  { %619 = vst.msk [vmem:[%s1066_s3] sm:$0xf] %vm618_vm2, %v713_v27  ;;  %v714_v35 = vpack.c.bf16 %v583_v28, %v583_v28  ;;  %v563_v36 = vmax.f32 %v549_v29, %v556_v30  ;;  %v550_v37 = vmax.f32 %v453_v31, %v455_v33  ;;  %v557_v38 = vmax.f32 %v524_v32, %v526_v34 }
 0x11b   :  { %620 = vst.msk [vmem:[%s1066_s3 + $0x4] sm:$0xf] %vm618_vm2, %v714_v35  ;;  %v577_v39 = vadd.f32 %v1027_v13, %v563_v36  ;;  %v564_v40 = vmax.f32 %v550_v37, %v557_v38 }
 0x11d   :  { %v584_v41 = vmax.f32 %v577_v39, 0.0  ;;  %v578_v42 = vadd.f32 %v1027_v13, %v564_v40  ;;  %v459_v43 = vpop.f32.mrb[8].mxu0  ;;  %v530_v44 = vpop.f32.mrb[8].mxu1 }
 0x11e   :  { %v461_v45 = vpop.f32.mrb[9].mxu0  ;;  %v532_v46 = vpop.f32.mrb[9].mxu1 }
 0x11f   :  { %v715_v47 = vpack.c.bf16 %v584_v41, %v584_v41  ;;  %v585_v48 = vmax.f32 %v578_v42, 0.0  ;;  %v551_v49 = vmax.f32 %v459_v43, %v461_v45  ;;  %v558_v50 = vmax.f32 %v530_v44, %v532_v46  ;;  %v463_v51 = vpop.f32.mrb[10].mxu0  ;;  %v534_v52 = vpop.f32.mrb[10].mxu1 }
 0x120   :  { %v465_v53 = vpop.f32.mrb[11].mxu0  ;;  %v536_v54 = vpop.f32.mrb[11].mxu1 }
 0x121   :  { %621 = vst.msk [vmem:[%s1066_s3 + $0x8] sm:$0xf] %vm618_vm2, %v715_v47  ;;  %v716_v55 = vpack.c.bf16 %v585_v48, %v585_v48  ;;  %v565_v56 = vmax.f32 %v551_v49, %v558_v50  ;;  %v552_v57 = vmax.f32 %v463_v51, %v465_v53  ;;  %v559_v58 = vmax.f32 %v534_v52, %v536_v54 }
 0x123   :  { %622 = vst.msk [vmem:[%s1066_s3 + $0xc] sm:$0xf] %vm618_vm2, %v716_v55  ;;  %v579_v59 = vadd.f32 %v1027_v13, %v565_v56  ;;  %v566_v60 = vmax.f32 %v552_v57, %v559_v58 }
 0x125   :  { %v586_v61 = vmax.f32 %v579_v59, 0.0  ;;  %v580_v62 = vadd.f32 %v1027_v13, %v566_v60  ;;  %v469_v63 = vpop.f32.mrb[12].mxu0  ;;  %v540_v0 = vpop.f32.mrb[12].mxu1 }
 0x126   :  { %v471_v1 = vpop.f32.mrb[13].mxu0  ;;  %v542_v2 = vpop.f32.mrb[13].mxu1 }
 0x127   :  { %v717_v3 = vpack.c.bf16 %v586_v61, %v586_v61  ;;  %v587_v4 = vmax.f32 %v580_v62, 0.0  ;;  %v553_v5 = vmax.f32 %v469_v63, %v471_v1  ;;  %v560_v6 = vmax.f32 %v540_v0, %v542_v2  ;;  %v473_v7 = vpop.f32.mrb[14].mxu0  ;;  %v544_v8 = vpop.f32.mrb[14].mxu1 }
 0x128   :  { %v474_v9 = vpop.f32.mrb[15].mxu0  ;;  %v545_v10 = vpop.f32.mrb[15].mxu1 }
 0x129   :  { %623 = vst.msk [vmem:[%s1066_s3 + $0x10] sm:$0xf] %vm618_vm2, %v717_v3  ;;  %v718_v11 = vpack.c.bf16 %v587_v4, %v587_v4  ;;  %v567_v12 = vmax.f32 %v553_v5, %v560_v6 }
 0x12b   :  { %624 = vst.msk [vmem:[%s1066_s3 + $0x14] sm:$0xf] %vm618_vm2, %v718_v11  ;;  %v581_v14 = vadd.f32 %v1027_v13, %v567_v12 }
 0x12d   :  { %v588_v15 = vmax.f32 %v581_v14, 0.0 }
 0x12f   :  { %v719_v16 = vpack.c.bf16 %v588_v15, %v588_v15 }
 0x131   :  { %626 = vst.msk [vmem:[%s1066_s3 + $0x18] sm:$0x1] %vm625_vm3, %v719_v16 }

// kernel: lenet_forward.5
= control target key start
LH: loop header
LB: loop body
LE: loop exit
PB: predicated region body
PF: predicated region fallthrough
CT: control target
= control target key end

     0   :  { %v785_v1 = vmov 0   ;;  %v98_v20 = vlaneseq  ;;  %v786_v25 = vmov 1966171168   ;;  %vm264_vm0 = vcmask 130048   ;;  %s1004_s0 = inlined_call_operand.vmem [shape: bf16[2,400], index: 0, kind: input, shape index: {}]   ;;  %s1005_s1 = inlined_call_operand.vmem [shape: bf16[400,128], index: 1, kind: input, shape index: {}]   ;;  %s1006_s2 = inlined_call_operand.vmem [shape: f32[1,128], index: 2, kind: input, shape index: {}]   ;;  %s1007_s3 = inlined_call_operand.vmem [shape: bf16[128,128], index: 3, kind: input, shape index: {}]   ;;  %s1008_s4 = inlined_call_operand.vmem [shape: f32[1,128], index: 4, kind: input, shape index: {}]   ;;  %s1009_s5 = inlined_call_operand.vmem [shape: bf16[128,128], index: 5, kind: input, shape index: {}]   ;;  %s1010_s6 = inlined_call_operand.vmem [shape: f32[1,128], index: 6, kind: input, shape index: {}]   ;;  %s1011_s7 = inlined_call_operand.hbm [shape: f32[2,128], index: 7, kind: output, shape index: {}]  }
   0x1   :  { %v720_v0 = vld [vmem:[%s1005_s1 + $0x40] sm:$0xff]   ;;  %308 = vmatprep.subr.bf16.mxu1 %v785_v1  ;;  %v723_v4 = vld [vmem:[%s1005_s1 + $0x48] sm:$0xff]   ;;  %v726_v7 = vld [vmem:[%s1005_s1 + $0x50] sm:$0xff]   ;;  %v96_v26 = vunpack.c.l.s4 %v786_v25  ;;  %v787_v38 = vmov 0.0  }
   0x2   :  { %v721_v2 = vld [vmem:[%s1005_s1 + $0x80] sm:$0xff]   ;;  %635 = vmatprep.subr.bf16.mxu0 %v720_v0  ;;  %v724_v5 = vld [vmem:[%s1005_s1 + $0x88] sm:$0xff]   ;;  %v727_v8 = vld [vmem:[%s1005_s1 + $0x90] sm:$0xff]   ;;  %v99_v27 = vshrl.u32 %v98_v20, 7 }
   0x3   :  { %v722_v3 = vld [vmem:[%s1005_s1] sm:$0xff]   ;;  %309 = vmatpush1.bf16.msra.mxu1 %v721_v2  ;;  %v725_v6 = vld [vmem:[%s1005_s1 + $0x8] sm:$0xff]   ;;  %v728_v9 = vld [vmem:[%s1005_s1 + $0x10] sm:$0xff]   ;;  %v97_v30 = vunpack.c.0.s8 %v96_v26 }
   0x4   :  { %636 = vmatpush3.bf16.msra.mxu0 %v722_v3  ;;  %310 = vmatprep.subr.bf16.mxu1 %v785_v1  ;;  %v729_v10 = vld [vmem:[%s1005_s1 + $0x58] sm:$0xff]   ;;  %v732_v13 = vld [vmem:[%s1005_s1 + $0x60] sm:$0xff]   ;;  %v735_v16 = vld [vmem:[%s1005_s1 + $0x68] sm:$0xff]  }
   0x5   :  { %637 = vmatprep.subr.bf16.mxu0 %v723_v4  ;;  %v730_v11 = vld [vmem:[%s1005_s1 + $0x98] sm:$0xff]   ;;  %v733_v14 = vld [vmem:[%s1005_s1 + $0xa0] sm:$0xff]   ;;  %v736_v17 = vld [vmem:[%s1005_s1 + $0xa8] sm:$0xff]   ;;  %v100_v32 = vsub.s32 %v97_v30, %v99_v27 }
   0x6   :  { %v731_v12 = vld [vmem:[%s1005_s1 + $0x18] sm:$0xff]   ;;  %v734_v15 = vld [vmem:[%s1005_s1 + $0x20] sm:$0xff]   ;;  %v737_v18 = vld [vmem:[%s1005_s1 + $0x28] sm:$0xff]  }
   0x7   :  { %311 = vmatpush1.bf16.msra.mxu1 %v724_v5  ;;  %v738_v19 = vld [vmem:[%s1005_s1 + $0x70] sm:$0xff]   ;;  %v590_v23 = vld.sshfl [vmem:[%s1004_s0] sm:$0x33 pattern:$0x75316420]  ;;  %v741_v24 = vld [vmem:[%s1005_s1 + $0x78] sm:$0xff]  }
   0x8   :  { %638 = vmatpush3.bf16.msra.mxu0 %v725_v6  ;;  %312 = vmatprep.subr.bf16.mxu1 %v785_v1  ;;  %v739_v21 = vld [vmem:[%s1005_s1 + $0xb0] sm:$0xff]   ;;  %v742_v28 = vld [vmem:[%s1005_s1 + $0xb8] sm:$0xff]   ;;  %v94_v29 = vcombine.high %v590_v23, %v590_v23  ;;  %v744_v33 = vld [vmem:[%s1005_s1 + $0xc0] sm:$0xff]   ;;  %v101_v36 = vrot.slane %v590_v23, %v100_v32 }
   0x9   :  { %639 = vmatprep.subr.bf16.mxu0 %v726_v7  ;;  %v740_v22 = vld [vmem:[%s1005_s1 + $0x30] sm:$0xff]   ;;  %v743_v31 = vld [vmem:[%s1005_s1 + $0x38] sm:$0xff]   ;;  %v745_v34 = vld [vmem:[%s1007_s3] sm:$0xff]  }
   0xa   :  { %v108_v35 = vrot.slane %v94_v29, %v100_v32  ;;  %v109_v39 = vcombine.high %v101_v36, %v101_v36  ;;  %v746_v40 = vld [vmem:[%s1007_s3 + $0x8] sm:$0xff]  }
   0xb   :  { %313 = vmatpush1.bf16.msra.mxu1 %v727_v8 }
   0xc   :  { %640 = vmatpush3.bf16.msra.mxu0 %v728_v9  ;;  %314 = vmatprep.subr.bf16.mxu1 %v785_v1  ;;  %v110_v37 = vcombine.high %v108_v35, %v108_v35 }
   0xd   :  { %641 = vmatprep.subr.bf16.mxu0 %v729_v10  ;;  %300 = vmatprep.mubr.bf16.mxu0 %v108_v35 }
   0xe   :  { %616 = vmatprep.mubr.msk.bf16.mxu1 %vm264_vm0, %v110_v37 }
   0xf   :  { %315 = vmatpush1.bf16.msra.mxu1 %v730_v11 }
  0x10   :  { %642 = vmatpush3.bf16.msra.mxu0 %v731_v12  ;;  %316 = vmatprep.subr.bf16.mxu1 %v785_v1 }
  0x11   :  { %643 = vmatprep.subr.bf16.mxu0 %v732_v13 }
  0x13   :  { %317 = vmatpush1.bf16.msra.mxu1 %v733_v14 }
  0x14   :  { %644 = vmatpush3.bf16.msra.mxu0 %v734_v15  ;;  %318 = vmatprep.subr.bf16.mxu1 %v785_v1 }
  0x15   :  { %645 = vmatprep.subr.bf16.mxu0 %v735_v16 }
  0x17   :  { %319 = vmatpush1.bf16.msra.mxu1 %v736_v17 }
  0x18   :  { %646 = vmatpush3.bf16.msra.mxu0 %v737_v18  ;;  %320 = vmatprep.subr.bf16.mxu1 %v785_v1 }
  0x19   :  { %647 = vmatprep.subr.bf16.mxu0 %v738_v19 }
  0x1b   :  { %321 = vmatpush1.bf16.msra.mxu1 %v739_v21 }
  0x1c   :  { %648 = vmatpush3.bf16.msra.mxu0 %v740_v22  ;;  %322 = vmatprep.subr.bf16.mxu1 %v785_v1 }
  0x1d   :  { %649 = vmatprep.subr.bf16.mxu0 %v741_v24 }
  0x1f   :  { %323 = vmatpush1.bf16.msra.mxu1 %v742_v28 }
  0x20   :  { %650 = vmatpush3.bf16.msra.mxu0 %v743_v31  ;;  %324 = vmatprep.subr.bf16.mxu1 %v785_v1 }
  0x21   :  { %675 = vmatprep.subr.bf16.mxu0 %v787_v38 }
  0x23   :  { %301 = vmatmul.mubr.bf16.vlgmr.msra.gmra.mrb[0].mxu0 %v101_v36  ;;  %325 = vmatpush1.bf16.msra.mxu1 %v744_v33 }
  0x24   :  { %676 = vmatpush3.bf16.msra.mxu0 %v745_v34  ;;  %695 = vmatprep.subr.bf16.mxu1 %v787_v38 }
  0x25   :  { %677 = vmatprep.subr.bf16.mxu0 %v787_v38 }
  0x26   :  { %341 = vmatmul.mubr.bf16.vlgmr.msra.gmra.mrb[0].mxu1 %v109_v39 }
  0x27   :  { %12 = vsyncpa [#allocation3], 0  ;;  %v747_v41 = vld [vmem:[%s1007_s3 + $0x10] sm:$0xff]   ;;  %v748_v42 = vld [vmem:[%s1007_s3 + $0x18] sm:$0xff]   ;;  %vm788_vm1 = vmmov 0   ;;  %s789_s16 = smov [#allocation2]  }
  0x28   :  { %678 = vmatpush3.bf16.msra.mxu0 %v746_v40  ;;  %v749_v43 = vld [vmem:[%s1007_s3 + $0x20] sm:$0xff]   ;;  %v750_v44 = vld [vmem:[%s1007_s3 + $0x28] sm:$0xff]   ;;  %v751_v45 = vld [vmem:[%s1007_s3 + $0x30] sm:$0xff]   ;;  %691 = vmatprep.mubr.msk.bf16.mxu0 %vm788_vm1, %v787_v38  ;;  %s581_s17 = sshll.u32 %s789_s16, 4  ;;  %s582_s17 = int_to_ptr.vmem [resolvable:$true] %s581_s17 }
  0x29   :  { %679 = vmatprep.subr.bf16.mxu0 %v787_v38  ;;  %v752_v46 = vld [vmem:[%s1007_s3 + $0x38] sm:$0xff]   ;;  %711 = vmatprep.mubr.msk.bf16.mxu1 %vm788_vm1, %v787_v38  ;;  %v753_v47 = vld [vmem:[%s1009_s5] sm:$0xff]   ;;  %v754_v48 = vld [vmem:[%s1009_s5 + $0x8] sm:$0xff]   ;;  %p766_p1 = scmp.lt.s32.totalorder %s582_s17, %s582_s17 }
  0x2a   :  { %696 = vmatpush3.bf16.msra.mxu1 %v753_v47  ;;  %v755_v49 = vld [vmem:[%s1009_s5 + $0x10] sm:$0xff]   ;;  %v756_v50 = vld [vmem:[%s1009_s5 + $0x18] sm:$0xff]   ;;  %v757_v51 = vld [vmem:[%s1009_s5 + $0x20] sm:$0xff]  }
  0x2b   :  { %697 = vmatprep.subr.bf16.mxu1 %v787_v38  ;;  %v758_v52 = vld [vmem:[%s1009_s5 + $0x28] sm:$0xff]   ;;  %v589_v55 = vld [vmem:[%s1006_s2] ss:$0 sm:$0xff]  ;;  %v759_v3 = vld [vmem:[%s1009_s5 + $0x30] sm:$0xff]  }
  0x2c   :  { %680 = vmatpush3.bf16.msra.mxu0 %v747_v41  ;;  %v760_v4 = vld [vmem:[%s1009_s5 + $0x38] sm:$0xff]   ;;  %v617_v5 = vld [vmem:[%s1008_s4] ss:$0 sm:$0xff]  ;;  %s761_s4 = scalar_lea.vmem %s582_s17, 32 }
  0x2d   :  { %681 = vmatprep.subr.bf16.mxu0 %v787_v38  ;;  %v626_v13 = vld [vmem:[%s1010_s6] ss:$0 sm:$0xff]  ;;  %p762_p0 = scmp.ne.s32.totalorder %s582_s17, %s761_s4  ;;  %p767_p2 = scmp.lt.s32.totalorder %s761_s4, %s761_s4 }
  0x2e   :  { %698 = vmatpush3.bf16.msra.mxu1 %v754_v48 }
  0x2f   :  { %699 = vmatprep.subr.bf16.mxu1 %v787_v38  ;;  %p768_p3 = por %p767_p2, %p766_p1 }
  0x30   :  { %682 = vmatpush3.bf16.msra.mxu0 %v748_v42 }
  0x31   :  { %683 = vmatprep.subr.bf16.mxu0 %v787_v38  ;;  %p769_p4 = pnand %p768_p3, %p762_p0 }
  0x32   :  { %700 = vmatpush3.bf16.msra.mxu1 %v755_v49 }
  0x33   :  { %701 = vmatprep.subr.bf16.mxu1 %v787_v38 }
  0x34   :  { %684 = vmatpush3.bf16.msra.mxu0 %v749_v43 }
  0x35   :  { %685 = vmatprep.subr.bf16.mxu0 %v787_v38 }
  0x36   :  { %702 = vmatpush3.bf16.msra.mxu1 %v756_v50 }
  0x37   :  { %703 = vmatprep.subr.bf16.mxu1 %v787_v38 }
  0x38   :  { %686 = vmatpush3.bf16.msra.mxu0 %v750_v44 }
  0x39   :  { %687 = vmatprep.subr.bf16.mxu0 %v787_v38 }
  0x3a   :  { %704 = vmatpush3.bf16.msra.mxu1 %v757_v51 }
  0x3b   :  { %705 = vmatprep.subr.bf16.mxu1 %v787_v38 }
  0x3c   :  { %688 = vmatpush3.bf16.msra.mxu0 %v751_v45 }
  0x3d   :  { %689 = vmatprep.subr.bf16.mxu0 %v787_v38 }
  0x3e   :  { %706 = vmatpush3.bf16.msra.mxu1 %v758_v52 }
  0x3f   :  { %707 = vmatprep.subr.bf16.mxu1 %v787_v38 }
  0x40   :  { %690 = vmatpush3.bf16.msra.mxu0 %v752_v46 }
  0x42   :  { %708 = vmatpush3.bf16.msra.mxu1 %v759_v3 }
  0x43   :  { %709 = vmatprep.subr.bf16.mxu1 %v787_v38 }
  0x46   :  { %710 = vmatpush3.bf16.msra.mxu1 %v760_v4 }
  0xf6   :  { %v651_v53 = vpop.f32.mrb[0].mxu0 }
  0xf7   :  { %v652_v54 = vpop.f32.mrb[1].mxu0 }
  0xf8   :  { %v653_v56 = vadd.f32 %v652_v54, %v651_v53  ;;  %v654_v57 = vpop.f32.mrb[2].mxu0 }
  0xf9   :  { %v655_v58 = vpop.f32.mrb[3].mxu0  ;;  %v342_v59 = vpop.f32.mrb[0].mxu1 }
  0xfa   :  { %v303_v60 = vadd.f32 %v653_v56, %v589_v55  ;;  %v344_v61 = vpop.f32.mrb[1].mxu1 }
  0xfb   :  { %v345_v62 = vpop.f32.mrb[2].mxu1 }
  0xfc   :  { %v343_v63 = vadd.f32 %v342_v59, %v303_v60  ;;  %v346_v0 = vpop.f32.mrb[3].mxu1 }
  0xfe   :  { %v348_v1 = vmax.f32 %v343_v63, 0.0 }
 0x100   :  { %v349_v2 = vpack.c.bf16 %v348_v1, %v348_v1 }
 0x102   :  { %692 = vmatmul.mubr.bf16.vlgmr.msra.gmra.mrb[4].mxu0 %v349_v2 }
 0x1d5   :  { %v455_v6 = vpop.f32.mrb[4].mxu0 }
 0x1d6   :  { %v456_v7 = vadd.f32 %v617_v5, %v455_v6  ;;  %v693_v8 = vpop.f32.mrb[5].mxu0 }
 0x1d7   :  { %v458_v9 = vpop.f32.mrb[6].mxu0 }
 0x1d8   :  { %v461_v10 = vmax.f32 %v456_v7, 0.0  ;;  %v694_v11 = vpop.f32.mrb[7].mxu0 }
 0x1da   :  { %v462_v12 = vpack.c.bf16 %v461_v10, %v461_v10 }
 0x1dc   :  { %712 = vmatmul.mubr.bf16.vlgmr.msra.gmra.mrb[4].mxu1 %v462_v12 }
 0x2af   :  { %v568_v14 = vpop.f32.mrb[4].mxu1 }
 0x2b0   :  { %v569_v15 = vadd.f32 %v626_v13, %v568_v14  ;;  %v713_v16 = vpop.f32.mrb[5].mxu1 }
 0x2b1   :  { %v571_v17 = vpop.f32.mrb[6].mxu1 }
 0x2b2   :  { %574 = vst [vmem:[#allocation2] sm:$0x3] %v569_v15  ;;  %v714_v18 = vpop.f32.mrb[7].mxu1 }
 0x2b3   :  { %772 = shalt.err (!%p769_p4)
}
 0x2b4   :  { %s773_s6 = scalar_lea.hbm %s1011_s7, 32 }
 0x2b5   :  { %p774_p5 = scmp.ne.s32.totalorder %s1011_s7, %s773_s6  ;;  %p777_p6 = scmp.lt.u32.totalorder %s773_s6, %s1011_s7 }
 0x2b7   :  { %p779_p7 = pnand %p777_p6, %p774_p5 }
 0x2b9   :  { %782 = shalt.err (!%p779_p7)
}
 0x2ba   :  { %584 = dma.vmem_to_hbm [thread:$0]  %s582_s17, 32, %s1011_s7, [#allocation3]  }
 0x2bb   :  { %783 = dma.done.wait [#allocation3], 32  }
 0x2bc   :  { %784 = vsyncadd [#allocation3], 4294967264 }
 0x2bd   :  { %588 = vsyncpa [#allocation3], 1 }

</bundles_post_ra>
